<compile_context>
chip_gen: v5e
topology: v5e:2x2
jax: 0.10.0
libtpu: 0.0.40
codegen_flags: <defaults>
</compile_context>

<pallas_src>
import functools

import jax
import jax.numpy as jnp
from jax.experimental import pallas as pl
from jax.experimental.pallas import tpu as pltpu


def _round_up(n, m):
    return ((n + m - 1) // m) * m


def _cdiv(a, b):
    return -(-a // b)


def _default_fold_k():
    """Fold factor from the local MXU granule.

    k batch elements per folded row so each block-diagonal weight stays inside
    one MXU tile column: 128-wide MXU (<= v5) -> k=42 (126/252 wide);
    256-wide MXU (v6e/v7x) -> k=85 (255/510 wide). Falls back to 42, which is
    correct (just slightly less dense) on every generation.
    """
    try:
        kind = jax.devices()[0].device_kind.lower()
    except Exception:
        return 42
    if "v6" in kind or "v7" in kind:
        return 85
    return 42


def net_map_kernel(x_ref, w1t_ref, b1_ref, w2t_ref, b2_ref, o_ref):
    # x:   (TB, 3k)   folded batch rows, lane-dense features
    # w1t: (3k, 6k)   block-diagonal, VMEM-resident
    # w2t: (6k, 3k)   block-diagonal, VMEM-resident
    # b1:  (1, 6k)    b2: (1, 3k)
    x = x_ref[...]
    h = jnp.dot(x, w1t_ref[...], preferred_element_type=jnp.float32) + b1_ref[...]
    h = jnp.maximum(h, 0.0)                                   # (TB, 6k)
    o_ref[...] = (
        jnp.dot(h, w2t_ref[...], preferred_element_type=jnp.float32) + b2_ref[...]
    )                                                         # (TB, 3k)


@functools.partial(jax.jit, static_argnums=(5, 6))
def _net_map_forward_impl(x, w1, b1, w2, b2, k, tb):
    B, in_f = x.shape
    hid = w1.shape[0]
    out_f = w2.shape[0]

    lanes_in = in_f * k        # 126 (k=42) or 255 (k=85)
    lanes_hid = hid * k        # 252 or 510
    lanes_out = out_f * k      # 126 or 255

    # ---- fold & tile geometry (all static) ----
    n_rows = _cdiv(B, k)       # folded rows (k batch elements each)
    # Tile large enough to amortize the ~0.35us/step pipeline overhead, but
    # keep >= 2 grid steps (megacore) when there is enough work.
    tb_eff = max(256, min(tb, _round_up(_cdiv(n_rows, 2), 256)))
    rows_pad = _round_up(n_rows, tb_eff)
    n_tiles = rows_pad // tb_eff
    total = rows_pad * k       # padded batch size

    # ---- lane-dense folded input (free reshape of the row-major buffer) ----
    x = x.astype(jnp.float32)
    if total != B:
        x = jnp.zeros((total, in_f), jnp.float32).at[:B].set(x)
    x_fold = x.reshape(rows_pad, lanes_in)

    # ---- block-diagonal transposed weights / tiled biases (built once) ----
    eye = jnp.eye(k, dtype=jnp.float32)
    w1t_bd = jnp.kron(eye, w1.astype(jnp.float32).T)          # (3k, 6k)
    w2t_bd = jnp.kron(eye, w2.astype(jnp.float32).T)          # (6k, 3k)
    b1_row = jnp.tile(b1.astype(jnp.float32), k)[None, :]     # (1, 6k)
    b2_row = jnp.tile(b2.astype(jnp.float32), k)[None, :]     # (1, 3k)

    # VMEM per step: double-buffered x/out blocks + hidden temp (lanes pad to 128).
    lp = lambda n: _round_up(n, 128)
    vmem_est = 4 * tb_eff * (2 * lp(lanes_in) + 2 * lp(lanes_out) + lp(lanes_hid))
    vmem_limit = int(min(max(2 * vmem_est, 32 << 20), 48 << 20))  # <=48MiB: safe on v7x

    out_fold = pl.pallas_call(
        net_map_kernel,
        out_shape=jax.ShapeDtypeStruct((rows_pad, lanes_out), jnp.float32),
        grid=(n_tiles,),
        in_specs=[
            pl.BlockSpec((tb_eff, lanes_in), lambda i: (i, 0)),     # x tile (pipelined)
            pl.BlockSpec((lanes_in, lanes_hid), lambda i: (0, 0)),  # W1_bd^T resident
            pl.BlockSpec((1, lanes_hid), lambda i: (0, 0)),         # b1 resident
            pl.BlockSpec((lanes_hid, lanes_out), lambda i: (0, 0)),  # W2_bd^T resident
            pl.BlockSpec((1, lanes_out), lambda i: (0, 0)),         # b2 resident
        ],
        out_specs=pl.BlockSpec((tb_eff, lanes_out), lambda i: (i, 0)),
        compiler_params=pltpu.CompilerParams(
            dimension_semantics=("parallel",),   # shard batch tiles across TCs (v7x)
            vmem_limit_bytes=vmem_limit,
        ),
    )(x_fold, w1t_bd, b1_row, w2t_bd, b2_row)

    # Unfold (free reshape); padded tail rows carry W2@relu(b1)+b2 garbage and
    # are sliced off here — never return the padded buffer directly.
    out = out_fold.reshape(total, out_f)
    return out[:B] if total != B else out


def net_map_forward(x, params, *, k=None, tb=4096):
    """x: [B, 3].  params: PyTorch-layout weights (w: [out, in], b: [out])."""
    if k is None:
        k = _default_fold_k()
    return _net_map_forward_impl(
        x, params["w1"], params["b1"], params["w2"], params["b2"], k, tb
    )


def init_params(key):
    """Deterministic init mirroring nn.Linear (weights kept as [out, in])."""
    k1, k2, k3, k4 = jax.random.split(key, 4)

    def lin_init(kw, kb, fan_in, fan_out):
        bound = 1.0 / jnp.sqrt(jnp.float32(fan_in))
        w = jax.random.uniform(kw, (fan_out, fan_in), jnp.float32, -bound, bound)
        b = jax.random.uniform(kb, (fan_out,), jnp.float32, -bound, bound)
        return w, b

    w1, b1 = lin_init(k1, k2, 3, 6)
    w2, b2 = lin_init(k3, k4, 6, 3)
    return {"w1": w1, "b1": b1, "w2": w2, "b2": b2}


def reference_forward(x, params):
    h = jnp.maximum(x @ params["w1"].T + params["b1"], 0.0)
    return h @ params["w2"].T + params["b2"]


if __name__ == "__main__":
    key = jax.random.PRNGKey(0)
    kx, kp = jax.random.split(key)

    B = 8  # small, deliberately not tile- or fold-aligned; wrapper pads
    x = jax.random.normal(kx, (B, 3), jnp.float32)
    params = init_params(kp)

    out = jax.block_until_ready(net_map_forward(x, params))
    ref = reference_forward(x.astype(jnp.float32), params)

    assert out.shape == (B, 3), out.shape
    # Module is f64 in PyTorch; kernel computes in f32 -> f32-level tolerance.
    assert jnp.allclose(out, ref, atol=1e-4, rtol=1e-4), "mismatch vs reference"

    print("KERNEL_OK")
</pallas_src>

<mosaic_0001>
module attributes {stable_mosaic.version = 11 : i64} {
  func.func @net_map_kernel(%arg0: i32, %arg1: memref<256x126xf32, #tpu.memory_space<vmem>>, %arg2: memref<126x252xf32, #tpu.memory_space<vmem>>, %arg3: memref<1x252xf32, #tpu.memory_space<vmem>>, %arg4: memref<252x126xf32, #tpu.memory_space<vmem>>, %arg5: memref<1x126xf32, #tpu.memory_space<vmem>>, %arg6: memref<256x126xf32, #tpu.memory_space<vmem>>) attributes {dimension_semantics = [#tpu.dimension_semantics<parallel>], iteration_bounds = array<i64: 1>, scalar_prefetch = 0 : i64, scratch_operands = 0 : i64, tpu.core_type = #tpu.core_type<tc>, window_params = [{transform_indices = @transform_0, window_bounds = array<i64: 256, 126>}, {pipeline_mode = #tpu.pipeline_mode<synchronous>, transform_indices = @transform_1, window_bounds = array<i64: 126, 252>}, {pipeline_mode = #tpu.pipeline_mode<synchronous>, transform_indices = @transform_2, window_bounds = array<i64: 1, 252>}, {pipeline_mode = #tpu.pipeline_mode<synchronous>, transform_indices = @transform_3, window_bounds = array<i64: 252, 126>}, {pipeline_mode = #tpu.pipeline_mode<synchronous>, transform_indices = @transform_4, window_bounds = array<i64: 1, 126>}, {transform_indices = @transform_5, window_bounds = array<i64: 256, 126>}]} {
    %c0 = arith.constant 0 : index
    %c0_0 = arith.constant 0 : index
    %0 = vector.load %arg1[%c0, %c0_0] : memref<256x126xf32, #tpu.memory_space<vmem>>, vector<256x126xf32>
    %c0_1 = arith.constant 0 : index
    %c0_2 = arith.constant 0 : index
    %1 = vector.load %arg2[%c0_1, %c0_2] : memref<126x252xf32, #tpu.memory_space<vmem>>, vector<126x252xf32>
    %cst = arith.constant dense<0.000000e+00> : vector<256x252xf32>
    %2 = tpu.matmul %0, %1, %cst {dimension_numbers = #tpu.dot_dimension_numbers<[1], [0], [0], [1], [0, 0, 1, 1], [], []>} : vector<256x126xf32>, vector<126x252xf32>, vector<256x252xf32> -> vector<256x252xf32>
    %c0_3 = arith.constant 0 : index
    %c0_4 = arith.constant 0 : index
    %3 = vector.load %arg3[%c0_3, %c0_4] : memref<1x252xf32, #tpu.memory_space<vmem>>, vector<1x252xf32>
    %4 = vector.broadcast %3 : vector<1x252xf32> to vector<256x252xf32>
    %5 = arith.addf %2, %4 : vector<256x252xf32>
    %cst_5 = arith.constant 0.000000e+00 : f32
    %6 = vector.broadcast %cst_5 : f32 to vector<256x252xf32>
    %7 = arith.maximumf %5, %6 : vector<256x252xf32>
    %c0_6 = arith.constant 0 : index
    %c0_7 = arith.constant 0 : index
    %8 = vector.load %arg4[%c0_6, %c0_7] : memref<252x126xf32, #tpu.memory_space<vmem>>, vector<252x126xf32>
    %cst_8 = arith.constant dense<0.000000e+00> : vector<256x126xf32>
    %9 = tpu.matmul %7, %8, %cst_8 {dimension_numbers = #tpu.dot_dimension_numbers<[1], [0], [0], [1], [0, 0, 1, 1], [], []>} : vector<256x252xf32>, vector<252x126xf32>, vector<256x126xf32> -> vector<256x126xf32>
    %c0_9 = arith.constant 0 : index
    %c0_10 = arith.constant 0 : index
    %10 = vector.load %arg5[%c0_9, %c0_10] : memref<1x126xf32, #tpu.memory_space<vmem>>, vector<1x126xf32>
    %11 = vector.broadcast %10 : vector<1x126xf32> to vector<256x126xf32>
    %12 = arith.addf %9, %11 : vector<256x126xf32>
    %c0_11 = arith.constant 0 : index
    %c0_12 = arith.constant 0 : index
    %13 = vector.load %arg6[%c0_11, %c0_12] : memref<256x126xf32, #tpu.memory_space<vmem>>, vector<256x126xf32>
    tpu.vector_store %arg6[%c0_11, %c0_12], %12 {strides = array<i32>} : memref<256x126xf32, #tpu.memory_space<vmem>>, vector<256x126xf32>,
    return
  }
  func.func @transform_0(%arg0: i32) -> (i32, i32) {
    %c0_i32 = arith.constant 0 : i32
    %c0_i32_0 = arith.constant 0 : i32
    return %arg0, %c0_i32 : i32, i32
  }
  func.func @transform_1(%arg0: i32) -> (i32, i32) {
    %c0_i32 = arith.constant 0 : i32
    %c0_i32_0 = arith.constant 0 : i32
    %c0_i32_1 = arith.constant 0 : i32
    return %c0_i32, %c0_i32_0 : i32, i32
  }
  func.func @transform_2(%arg0: i32) -> (i32, i32) {
    %c0_i32 = arith.constant 0 : i32
    %c0_i32_0 = arith.constant 0 : i32
    %c0_i32_1 = arith.constant 0 : i32
    return %c0_i32, %c0_i32_0 : i32, i32
  }
  func.func @transform_3(%arg0: i32) -> (i32, i32) {
    %c0_i32 = arith.constant 0 : i32
    %c0_i32_0 = arith.constant 0 : i32
    %c0_i32_1 = arith.constant 0 : i32
    return %c0_i32, %c0_i32_0 : i32, i32
  }
  func.func @transform_4(%arg0: i32) -> (i32, i32) {
    %c0_i32 = arith.constant 0 : i32
    %c0_i32_0 = arith.constant 0 : i32
    %c0_i32_1 = arith.constant 0 : i32
    return %c0_i32, %c0_i32_0 : i32, i32
  }
  func.func @transform_5(%arg0: i32) -> (i32, i32) {
    %c0_i32 = arith.constant 0 : i32
    %c0_i32_0 = arith.constant 0 : i32
    return %arg0, %c0_i32 : i32, i32
  }
}

</mosaic_0001>

<bundles_post_ra>
// kernel: tile.13
= control target key start
LH: loop header
LB: loop body
LE: loop exit
PB: predicated region body
PF: predicated region fallthrough
CT: control target
= control target key end

     0   :  { %s52_s0 = inlined_call_operand.vmem [shape: f32[6], index: 0, kind: input, shape index: {}]   ;;  %s53_s1 = inlined_call_operand.vmem [shape: f32[42,6], index: 1, kind: output, shape index: {}]  }
   0x1   :  { %v4_v0 = vld [vmem:[%s52_s0] ss:$0 sm:$0xff] }
   0x2   :  { %5 = vst [vmem:[%s53_s1] sm:$0xff] %v4_v0 }
   0x3   :  { %16 = vst [vmem:[%s53_s1 + $0x8] sm:$0xff] %v4_v0 }
   0x4   :  { %17 = vst [vmem:[%s53_s1 + $0x10] sm:$0xff] %v4_v0 }
   0x5   :  { %18 = vst [vmem:[%s53_s1 + $0x18] sm:$0xff] %v4_v0 }
   0x6   :  { %19 = vst [vmem:[%s53_s1 + $0x20] sm:$0xff] %v4_v0 }
   0x7   :  { %20 = vst [vmem:[%s53_s1 + $0x28] sm:$0xff] %v4_v0 }

// kernel: tile.14
= control target key start
LH: loop header
LB: loop body
LE: loop exit
PB: predicated region body
PF: predicated region fallthrough
CT: control target
= control target key end

     0   :  { %vm9_vm0 = vcmask 15360   ;;  %s374_s10 = smov 118   ;;  %s375_s13 = smov 126   ;;  %vm3_vm1 = vcmask 48128   ;;  %vm13_vm2 = vcmask 31744   ;;  %vm16_vm3 = vcmask 1048560   ;;  %s560_s0 = inlined_call_operand.vmem [shape: f32[42,6], index: 0, kind: input, shape index: {}]   ;;  %s561_s1 = inlined_call_operand.vmem [shape: f32[1,252], index: 1, kind: output, shape index: {}]  }
   0x1   :  { %v293_v0 = vld [vmem:[%s560_s0 + $0x29] sm:$0x1]   ;;  %v290_v1 = vld [vmem:[%s560_s0 + $0x15] sm:$0x1]   ;;  %v295_v4 = vld [vmem:[%s560_s0 + $0x28] sm:$0x1]  }
   0x2   :  { %26 = vrot.lane.b32.xlu1 %v293_v0, %s374_s10  ;;  %v291_v2 = vld [vmem:[%s560_s0 + $0x15] sm:$0x1]   ;;  %s376_s16 = smov 112   ;;  %v294_v5 = vld [vmem:[%s560_s0 + $0x13] sm:$0x1]   ;;  %s377_s21 = smov 114  }
   0x3   :  { %v10_v3 = vsel %vm9_vm0, %v291_v2, %v290_v1  ;;  %39 = vrot.lane.b32.xlu2 %v295_v4, %s376_s16  ;;  %v292_v6 = vld [vmem:[%s560_s0 + $0x14] sm:$0x1]   ;;  %v296_v7 = vld [vmem:[%s560_s0 + $0x12] sm:$0x1]   ;;  %s378_s24 = smov 120   ;;  %s379_s25 = smov 108  }
   0x4   :  { %11 = vrot.lane.b32.xlu0 %v10_v3, %s375_s13  ;;  %v298_v8 = vld [vmem:[%s560_s0 + $0x11] sm:$0x1]   ;;  %v297_v9 = vld [vmem:[%s560_s0 + $0x27] sm:$0x1]   ;;  %s380_s30 = smov 102   ;;  %s381_s4 = smov 106  }
   0x5   :  { %v299_v10 = vld [vmem:[%s560_s0 + $0x26] sm:$0x1]   ;;  %s382_s5 = smov 100   ;;  %v301_v11 = vld [vmem:[%s560_s0 + $0x25] sm:$0x1]   ;;  %s383_s10 = smov 94  }
   0x6   :  { %v300_v12 = vld [vmem:[%s560_s0 + $0x10] sm:$0x1]   ;;  %v302_v13 = vld [vmem:[%s560_s0 + $0xf] sm:$0x1]   ;;  %s384_s13 = smov 96   ;;  %s385_s14 = smov 90  }
   0x7   :  { %v304_v14 = vld [vmem:[%s560_s0 + $0xe] sm:$0x1]   ;;  %v303_v15 = vld [vmem:[%s560_s0 + $0x24] sm:$0x1]   ;;  %s386_s19 = smov 84   ;;  %s387_s22 = smov 88  }
   0x8   :  { %v305_v16 = vld [vmem:[%s560_s0 + $0x23] sm:$0x1]   ;;  %s388_s23 = smov 82   ;;  %v307_v17 = vld [vmem:[%s560_s0 + $0x22] sm:$0x1]   ;;  %s389_s28 = smov 76  }
   0x9   :  { %v306_v18 = vld [vmem:[%s560_s0 + $0xd] sm:$0x1]   ;;  %v308_v19 = vld [vmem:[%s560_s0 + $0xc] sm:$0x1]   ;;  %s390_s2 = smov 78   ;;  %s391_s3 = smov 72  }
   0xa   :  { %33 = vrot.lane.b32.xlu1 %v294_v5, %s377_s21  ;;  %v310_v20 = vld [vmem:[%s560_s0 + $0xb] sm:$0x1]   ;;  %v309_v21 = vld [vmem:[%s560_s0 + $0x21] sm:$0x1]   ;;  %s392_s8 = smov 66   ;;  %s393_s11 = smov 70  }
   0xb   :  { %46 = vrot.lane.b32.xlu2 %v296_v7, %s379_s25  ;;  %v311_v22 = vld [vmem:[%s560_s0 + $0x20] sm:$0x1]   ;;  %s394_s12 = smov 64   ;;  %v313_v23 = vld [vmem:[%s560_s0 + $0x1f] sm:$0x1]   ;;  %s395_s17 = smov 58  }
   0xc   :  { %20 = vrot.lane.b32.xlu0 %v292_v6, %s378_s24  ;;  %v312_v24 = vld [vmem:[%s560_s0 + $0xa] sm:$0x1]   ;;  %v314_v25 = vld [vmem:[%s560_s0 + $0x9] sm:$0x1]   ;;  %s396_s20 = smov 60   ;;  %s397_s21 = smov 54  }
   0xd   :  { %v316_v26 = vld [vmem:[%s560_s0 + $0x8] sm:$0x1]   ;;  %v315_v27 = vld [vmem:[%s560_s0 + $0x1e] sm:$0x1]   ;;  %s398_s26 = smov 48   ;;  %s399_s29 = smov 52  }
   0xe   :  { %v317_v28 = vld [vmem:[%s560_s0 + $0x1d] sm:$0x1]   ;;  %v319_v29 = vld [vmem:[%s560_s0 + $0x1c] sm:$0x1]   ;;  %v318_v30 = vld [vmem:[%s560_s0 + $0x7] sm:$0x1]  }
   0xf   :  { %s401_s6 = smov 40   ;;  %v320_v31 = vld [vmem:[%s560_s0 + $0x6] sm:$0x1]   ;;  %s402_s9 = smov 42   ;;  %v322_v32 = vld [vmem:[%s560_s0 + $0x5] sm:$0x1]  }
  0x10   :  { %v321_v33 = vld [vmem:[%s560_s0 + $0x1b] sm:$0x1]   ;;  %s404_s15 = smov 30   ;;  %v323_v34 = vld [vmem:[%s560_s0 + $0x1a] sm:$0x1]   ;;  %s405_s18 = smov 34  }
  0x11   :  { %v2_v35 = vld [vmem:[%s560_s0] sm:$0x1]   ;;  %v325_v36 = vld [vmem:[%s560_s0 + $0x19] sm:$0x1]   ;;  %v324_v37 = vld [vmem:[%s560_s0 + $0x4] sm:$0x1]  }
  0x12   :  { %59 = vrot.lane.b32.xlu1 %v298_v8, %s380_s30  ;;  %s400_s30 = smov 46   ;;  %4 = vst.msk [vmem:[#allocation0] sm:$0x1] %vm3_vm1, %v2_v35   ;;  %v326_v38 = vld [vmem:[%s560_s0 + $0x3] sm:$0x1]   ;;  %vm28_vm4 = vcmask 1015728  }
  0x13   :  { %65 = vrot.lane.b32.xlu2 %v299_v10, %s382_s5  ;;  %v328_v39 = vld [vmem:[%s560_s0 + $0x2] sm:$0x1]   ;;  %v327_v41 = vld [vmem:[%s560_s0 + $0x18] sm:$0x1]   ;;  %v329_v42 = vld [vmem:[%s560_s0 + $0x17] sm:$0x1]  }
  0x14   :  { %52 = vrot.lane.b32.xlu0 %v297_v9, %s381_s4  ;;  %v331_v43 = vld [vmem:[%s560_s0 + $0x16] sm:$0x1]   ;;  %v330_v45 = vld [vmem:[%s560_s0 + $0x1] sm:$0x1]   ;;  %s413_s0 = smov 4   ;;  %vm41_vm5 = vcmask 966528  }
  0x15   :  { %vm22_vm6 = vcmask 1032128   ;;  %vm35_vm7 = vcmask 982928   ;;  %vm48_vm8 = vcmask 933728   ;;  %vm61_vm9 = vcmask 884528  }
  0x16   :  { %vm54_vm10 = vcmask 917328   ;;  %vm67_vm11 = vcmask 868128   ;;  %vm80_vm12 = vcmask 818928   ;;  %vm74_vm13 = vcmask 835328  }
  0x17   :  { %vm87_vm14 = vcmask 786128   ;;  %vm100_vm15 = vcmask 736928   ;;  %vm93_vm0 = vcmask 769728   ;;  %vm106_vm1 = vcmask 720528  }
  0x1a   :  { %78 = vrot.lane.b32.xlu1 %v301_v11, %s383_s10  ;;  %s403_s10 = smov 36  }
  0x1b   :  { %85 = vrot.lane.b32.xlu2 %v302_v13, %s385_s14 }
  0x1c   :  { %72 = vrot.lane.b32.xlu0 %v300_v12, %s384_s13 }
  0x22   :  { %98 = vrot.lane.b32.xlu1 %v304_v14, %s386_s19 }
  0x23   :  { %104 = vrot.lane.b32.xlu2 %v305_v16, %s388_s23 }
  0x24   :  { %91 = vrot.lane.b32.xlu0 %v303_v15, %s387_s22 }
  0x2a   :  { %117 = vrot.lane.b32.xlu1 %v307_v17, %s389_s28 }
  0x2b   :  { %124 = vrot.lane.b32.xlu2 %v308_v19, %s391_s3 }
  0x2c   :  { %111 = vrot.lane.b32.xlu0 %v306_v18, %s390_s2 }
  0x32   :  { %137 = vrot.lane.b32.xlu1 %v310_v20, %s392_s8 }
  0x33   :  { %143 = vrot.lane.b32.xlu2 %v311_v22, %s394_s12 }
  0x34   :  { %130 = vrot.lane.b32.xlu0 %v309_v21, %s393_s11 }
  0x3a   :  { %156 = vrot.lane.b32.xlu1 %v313_v23, %s395_s17 }
  0x3b   :  { %163 = vrot.lane.b32.xlu2 %v314_v25, %s397_s21  ;;  %s406_s21 = smov 28  }
  0x3c   :  { %150 = vrot.lane.b32.xlu0 %v312_v24, %s396_s20 }
  0x42   :  { %176 = vrot.lane.b32.xlu1 %v316_v26, %s398_s26  ;;  %s407_s26 = smov 22  }
  0x43   :  { %182 = vrot.lane.b32.xlu2 %v317_v28, %s400_s30  ;;  %s409_s30 = smov 18  }
  0x44   :  { %169 = vrot.lane.b32.xlu0 %v315_v27, %s399_s29  ;;  %s408_s29 = smov 24  }
  0x4a   :  { %195 = vrot.lane.b32.xlu1 %v319_v29, %s401_s6  ;;  %s410_s6 = smov 12  }
  0x4b   :  { %202 = vrot.lane.b32.xlu2 %v320_v31, %s403_s10  ;;  %s412_s10 = smov 10  }
  0x4c   :  { %189 = vrot.lane.b32.xlu0 %v318_v30, %s402_s9  ;;  %s411_s9 = smov 16  }
  0x52   :  { %215 = vrot.lane.b32.xlu1 %v322_v32, %s404_s15  ;;  %s414_s15 = smov 6  }
  0x53   :  { %221 = vrot.lane.b32.xlu2 %v323_v34, %s406_s21 }
  0x54   :  { %208 = vrot.lane.b32.xlu0 %v321_v33, %s405_s18 }
  0x5a   :  { %234 = vrot.lane.b32.xlu1 %v325_v36, %s407_s26 }
  0x5b   :  { %241 = vrot.lane.b32.xlu2 %v326_v38, %s409_s30 }
  0x5c   :  { %228 = vrot.lane.b32.xlu0 %v324_v37, %s408_s29 }
  0x5d   :  { %v40_v40 = vpop.permute.xlu2 %39  }
  0x62   :  { %254 = vrot.lane.b32.xlu1 %v328_v39, %s410_s6 }
  0x63   :  { %260 = vrot.lane.b32.xlu2 %v329_v42, %s412_s10 }
  0x64   :  { %247 = vrot.lane.b32.xlu0 %v327_v41, %s411_s9 }
  0x65   :  { %v47_v44 = vpop.permute.xlu2 %46  }
  0x6a   :  { %273 = vrot.lane.b32.xlu1 %v331_v43, %s413_s0 }
  0x6c   :  { %267 = vrot.lane.b32.xlu0 %v330_v45, %s414_s15 }
  0x6d   :  { %v66_v46 = vpop.permute.xlu2 %65  }
  0x74   :  { %v27_v47 = vpop.permute.xlu1 %26  }
  0x75   :  { %v86_v49 = vpop.permute.xlu2 %85  }
  0x76   :  { %v12_v48 = vpop.permute.xlu0 %11  }
  0x77   :  { %15 = vst.msk [vmem:[#allocation0 + $0x8] sm:$0x1] %vm13_vm2, %v12_v48   ;;  %vm119_vm2 = vcmask 671328  }
  0x78   :  { %17 = vst.msk [vmem:[#allocation0] sm:$0x1] %vm16_vm3, %v12_v48   ;;  %vm113_vm3 = vcmask 687728  }
  0x79   :  { %30 = vst.msk [vmem:[#allocation0 + $0x8] sm:$0x1] %vm28_vm4, %v27_v47   ;;  %vm126_vm4 = vcmask 638528  }
  0x7a   :  { %43 = vst.msk [vmem:[#allocation0 + $0x8] sm:$0x1] %vm41_vm5, %v40_v40   ;;  %vm139_vm5 = vcmask 589328  }
  0x7c   :  { %v34_v50 = vpop.permute.xlu1 %33  }
  0x7d   :  { %v105_v52 = vpop.permute.xlu2 %104  }
  0x7e   :  { %v21_v51 = vpop.permute.xlu0 %20  }
  0x7f   :  { %23 = vst.msk [vmem:[#allocation0] sm:$0x1] %vm22_vm6, %v21_v51   ;;  %vm132_vm6 = vcmask 622128  }
  0x80   :  { %36 = vst.msk [vmem:[#allocation0] sm:$0x1] %vm35_vm7, %v34_v50   ;;  %vm145_vm7 = vcmask 572928  }
  0x81   :  { %49 = vst.msk [vmem:[#allocation0] sm:$0x1] %vm48_vm8, %v47_v44   ;;  %vm158_vm8 = vcmask 523728  }
  0x84   :  { %v60_v53 = vpop.permute.xlu1 %59  }
  0x85   :  { %62 = vst.msk [vmem:[#allocation0] sm:$0x1] %vm61_vm9, %v60_v53   ;;  %v125_v55 = vpop.permute.xlu2 %124   ;;  %vm152_vm9 = vcmask 540128  }
  0x86   :  { %v53_v54 = vpop.permute.xlu0 %52  }
  0x87   :  { %56 = vst.msk [vmem:[#allocation0 + $0x8] sm:$0x1] %vm54_vm10, %v53_v54   ;;  %vm165_vm10 = vcmask 490928  }
  0x88   :  { %69 = vst.msk [vmem:[#allocation0 + $0x8] sm:$0x1] %vm67_vm11, %v66_v46   ;;  %vm178_vm11 = vcmask 441728  }
  0x8c   :  { %v79_v56 = vpop.permute.xlu1 %78  }
  0x8d   :  { %82 = vst.msk [vmem:[#allocation0 + $0x8] sm:$0x1] %vm80_vm12, %v79_v56   ;;  %v144_v58 = vpop.permute.xlu2 %143   ;;  %vm171_vm12 = vcmask 474528  }
  0x8e   :  { %v73_v57 = vpop.permute.xlu0 %72  }
  0x8f   :  { %75 = vst.msk [vmem:[#allocation0] sm:$0x1] %vm74_vm13, %v73_v57   ;;  %vm184_vm13 = vcmask 425328  }
  0x90   :  { %88 = vst.msk [vmem:[#allocation0] sm:$0x1] %vm87_vm14, %v86_v49   ;;  %vm197_vm14 = vcmask 376128  }
  0x94   :  { %v99_v59 = vpop.permute.xlu1 %98  }
  0x95   :  { %101 = vst.msk [vmem:[#allocation0] sm:$0x1] %vm100_vm15, %v99_v59   ;;  %v164_v61 = vpop.permute.xlu2 %163   ;;  %vm191_vm15 = vcmask 392528  }
  0x96   :  { %v92_v60 = vpop.permute.xlu0 %91  }
  0x97   :  { %95 = vst.msk [vmem:[#allocation0 + $0x8] sm:$0x1] %vm93_vm0, %v92_v60   ;;  %vm204_vm0 = vcmask 343328  }
  0x98   :  { %108 = vst.msk [vmem:[#allocation0 + $0x8] sm:$0x1] %vm106_vm1, %v105_v52   ;;  %vm217_vm1 = vcmask 294128  }
  0x9c   :  { %v118_v62 = vpop.permute.xlu1 %117  }
  0x9d   :  { %121 = vst.msk [vmem:[#allocation0 + $0x8] sm:$0x1] %vm119_vm2, %v118_v62   ;;  %v183_v0 = vpop.permute.xlu2 %182   ;;  %vm210_vm2 = vcmask 326928  }
  0x9e   :  { %v112_v63 = vpop.permute.xlu0 %111  }
  0x9f   :  { %114 = vst.msk [vmem:[#allocation0] sm:$0x1] %vm113_vm3, %v112_v63   ;;  %vm223_vm3 = vcmask 277728  }
  0xa0   :  { %127 = vst.msk [vmem:[#allocation0] sm:$0x1] %vm126_vm4, %v125_v55   ;;  %vm236_vm4 = vcmask 228528  }
  0xa4   :  { %v138_v1 = vpop.permute.xlu1 %137  }
  0xa5   :  { %140 = vst.msk [vmem:[#allocation0] sm:$0x1] %vm139_vm5, %v138_v1   ;;  %v203_v3 = vpop.permute.xlu2 %202   ;;  %vm230_vm5 = vcmask 244928  }
  0xa6   :  { %v131_v2 = vpop.permute.xlu0 %130  }
  0xa7   :  { %134 = vst.msk [vmem:[#allocation0 + $0x8] sm:$0x1] %vm132_vm6, %v131_v2   ;;  %vm243_vm6 = vcmask 195728  }
  0xa8   :  { %147 = vst.msk [vmem:[#allocation0 + $0x8] sm:$0x1] %vm145_vm7, %v144_v58   ;;  %vm256_vm7 = vcmask 146528  }
  0xac   :  { %v157_v4 = vpop.permute.xlu1 %156  }
  0xad   :  { %160 = vst.msk [vmem:[#allocation0 + $0x8] sm:$0x1] %vm158_vm8, %v157_v4   ;;  %v222_v6 = vpop.permute.xlu2 %221   ;;  %vm249_vm8 = vcmask 179328  }
  0xae   :  { %v151_v5 = vpop.permute.xlu0 %150  }
  0xaf   :  { %153 = vst.msk [vmem:[#allocation0] sm:$0x1] %vm152_vm9, %v151_v5   ;;  %vm262_vm9 = vcmask 130128  }
  0xb0   :  { %166 = vst.msk [vmem:[#allocation0] sm:$0x1] %vm165_vm10, %v164_v61   ;;  %vm275_vm10 = vcmask 80928  }
  0xb4   :  { %v177_v7 = vpop.permute.xlu1 %176  }
  0xb5   :  { %179 = vst.msk [vmem:[#allocation0] sm:$0x1] %vm178_vm11, %v177_v7   ;;  %v242_v9 = vpop.permute.xlu2 %241   ;;  %vm269_vm11 = vcmask 97328  }
  0xb6   :  { %v170_v8 = vpop.permute.xlu0 %169  }
  0xb7   :  { %173 = vst.msk [vmem:[#allocation0 + $0x8] sm:$0x1] %vm171_vm12, %v170_v8  }
  0xb8   :  { %186 = vst.msk [vmem:[#allocation0 + $0x8] sm:$0x1] %vm184_vm13, %v183_v0  }
  0xbc   :  { %v196_v10 = vpop.permute.xlu1 %195  }
  0xbd   :  { %199 = vst.msk [vmem:[#allocation0 + $0x8] sm:$0x1] %vm197_vm14, %v196_v10   ;;  %v261_v12 = vpop.permute.xlu2 %260  }
  0xbe   :  { %v190_v11 = vpop.permute.xlu0 %189  }
  0xbf   :  { %192 = vst.msk [vmem:[#allocation0] sm:$0x1] %vm191_vm15, %v190_v11  }
  0xc0   :  { %205 = vst.msk [vmem:[#allocation0] sm:$0x1] %vm204_vm0, %v203_v3  }
  0xc4   :  { %v216_v13 = vpop.permute.xlu1 %215  }
  0xc5   :  { %218 = vst.msk [vmem:[#allocation0] sm:$0x1] %vm217_vm1, %v216_v13  }
  0xc6   :  { %v209_v14 = vpop.permute.xlu0 %208  }
  0xc7   :  { %212 = vst.msk [vmem:[#allocation0 + $0x8] sm:$0x1] %vm210_vm2, %v209_v14  }
  0xc8   :  { %225 = vst.msk [vmem:[#allocation0 + $0x8] sm:$0x1] %vm223_vm3, %v222_v6  }
  0xcc   :  { %v235_v15 = vpop.permute.xlu1 %234  }
  0xcd   :  { %238 = vst.msk [vmem:[#allocation0 + $0x8] sm:$0x1] %vm236_vm4, %v235_v15  }
  0xce   :  { %v229_v16 = vpop.permute.xlu0 %228  }
  0xcf   :  { %231 = vst.msk [vmem:[#allocation0] sm:$0x1] %vm230_vm5, %v229_v16  }
  0xd0   :  { %244 = vst.msk [vmem:[#allocation0] sm:$0x1] %vm243_vm6, %v242_v9  }
  0xd4   :  { %v255_v17 = vpop.permute.xlu1 %254  }
  0xd5   :  { %257 = vst.msk [vmem:[#allocation0] sm:$0x1] %vm256_vm7, %v255_v17  }
  0xd6   :  { %v248_v18 = vpop.permute.xlu0 %247  }
  0xd7   :  { %251 = vst.msk [vmem:[#allocation0 + $0x8] sm:$0x1] %vm249_vm8, %v248_v18  }
  0xd8   :  { %264 = vst.msk [vmem:[#allocation0 + $0x8] sm:$0x1] %vm262_vm9, %v261_v12  }
  0xdc   :  { %v274_v19 = vpop.permute.xlu1 %273  }
  0xdd   :  { %277 = vst.msk [vmem:[#allocation0 + $0x8] sm:$0x1] %vm275_vm10, %v274_v19  }
  0xde   :  { %v268_v20 = vpop.permute.xlu0 %267  }
  0xdf   :  { %270 = vst.msk [vmem:[#allocation0] sm:$0x1] %vm269_vm11, %v268_v20  }
  0xe4   :  { %v285_v21 = vld [vmem:[#allocation0 + $0x8] sm:$0x1] }
  0xe5   :  { %332 = vst [vmem:[%s561_s1 + $0x1] sm:$0x1] %v285_v21 }
  0xe6   :  { %v280_v22 = vld [vmem:[#allocation0] sm:$0x1] }
  0xe7   :  { %283 = vst [vmem:[%s561_s1] sm:$0x1] %v280_v22 }

// kernel: tile.18
= control target key start
LH: loop header
LB: loop body
LE: loop exit
PB: predicated region body
PF: predicated region fallthrough
CT: control target
= control target key end

     0   :  { %s52_s0 = inlined_call_operand.vmem [shape: f32[3], index: 0, kind: input, shape index: {}]   ;;  %s53_s1 = inlined_call_operand.vmem [shape: f32[42,3], index: 1, kind: output, shape index: {}]  }
   0x1   :  { %v4_v0 = vld [vmem:[%s52_s0] ss:$0 sm:$0xff] }
   0x2   :  { %5 = vst [vmem:[%s53_s1] sm:$0xff] %v4_v0 }
   0x3   :  { %16 = vst [vmem:[%s53_s1 + $0x8] sm:$0xff] %v4_v0 }
   0x4   :  { %17 = vst [vmem:[%s53_s1 + $0x10] sm:$0xff] %v4_v0 }
   0x5   :  { %18 = vst [vmem:[%s53_s1 + $0x18] sm:$0xff] %v4_v0 }
   0x6   :  { %19 = vst [vmem:[%s53_s1 + $0x20] sm:$0xff] %v4_v0 }
   0x7   :  { %20 = vst [vmem:[%s53_s1 + $0x28] sm:$0xff] %v4_v0 }

// kernel: tile.19
= control target key start
LH: loop header
LB: loop body
LE: loop exit
PB: predicated region body
PF: predicated region fallthrough
CT: control target
= control target key end

     0   :  { %s339_s10 = smov 123   ;;  %s340_s11 = smov 117   ;;  %vm3_vm0 = vcmask 23552   ;;  %vm9_vm1 = vcmask 1032152   ;;  %vm15_vm2 = vcmask 1007552   ;;  %vm21_vm3 = vcmask 982952   ;;  %s519_s0 = inlined_call_operand.vmem [shape: f32[42,3], index: 0, kind: input, shape index: {}]   ;;  %s520_s1 = inlined_call_operand.vmem [shape: f32[1,126], index: 1, kind: output, shape index: {}]  }
   0x1   :  { %v257_v0 = vld [vmem:[%s519_s0 + $0x29] sm:$0x1]   ;;  %v259_v1 = vld [vmem:[%s519_s0 + $0x27] sm:$0x1]   ;;  %v261_v2 = vld [vmem:[%s519_s0 + $0x25] sm:$0x1]  }
   0x2   :  { %7 = vrot.lane.b32.xlu0 %v257_v0, %s339_s10  ;;  %19 = vrot.lane.b32.xlu1 %v259_v1, %s340_s11  ;;  %s341_s14 = smov 111   ;;  %v258_v3 = vld [vmem:[%s519_s0 + $0x28] sm:$0x1]   ;;  %v260_v4 = vld [vmem:[%s519_s0 + $0x26] sm:$0x1]   ;;  %s342_s19 = smov 120  }
   0x3   :  { %31 = vrot.lane.b32.xlu2 %v261_v2, %s341_s14  ;;  %s343_s20 = smov 114   ;;  %v262_v5 = vld [vmem:[%s519_s0 + $0x24] sm:$0x1]   ;;  %s344_s23 = smov 108   ;;  %v263_v6 = vld [vmem:[%s519_s0 + $0x23] sm:$0x1]  }
   0x4   :  { %v264_v7 = vld [vmem:[%s519_s0 + $0x22] sm:$0x1]   ;;  %s345_s28 = smov 105   ;;  %s346_s29 = smov 102   ;;  %v265_v8 = vld [vmem:[%s519_s0 + $0x21] sm:$0x1]  }
   0x5   :  { %s347_s3 = smov 99   ;;  %v266_v9 = vld [vmem:[%s519_s0 + $0x20] sm:$0x1]   ;;  %v267_v10 = vld [vmem:[%s519_s0 + $0x1f] sm:$0x1]   ;;  %s348_s8 = smov 96  }
   0x6   :  { %s349_s9 = smov 93   ;;  %v268_v11 = vld [vmem:[%s519_s0 + $0x1e] sm:$0x1]   ;;  %s350_s12 = smov 90   ;;  %v269_v12 = vld [vmem:[%s519_s0 + $0x1d] sm:$0x1]  }
   0x7   :  { %v270_v13 = vld [vmem:[%s519_s0 + $0x1c] sm:$0x1]   ;;  %s351_s17 = smov 87   ;;  %s352_s18 = smov 84   ;;  %v271_v14 = vld [vmem:[%s519_s0 + $0x1b] sm:$0x1]  }
   0x8   :  { %s353_s21 = smov 81   ;;  %v272_v15 = vld [vmem:[%s519_s0 + $0x1a] sm:$0x1]   ;;  %v273_v16 = vld [vmem:[%s519_s0 + $0x19] sm:$0x1]   ;;  %s354_s26 = smov 78  }
   0x9   :  { %s355_s27 = smov 75   ;;  %v274_v17 = vld [vmem:[%s519_s0 + $0x18] sm:$0x1]   ;;  %s356_s30 = smov 72   ;;  %v275_v18 = vld [vmem:[%s519_s0 + $0x17] sm:$0x1]  }
   0xa   :  { %13 = vrot.lane.b32.xlu0 %v258_v3, %s342_s19  ;;  %25 = vrot.lane.b32.xlu1 %v260_v4, %s343_s20  ;;  %v276_v19 = vld [vmem:[%s519_s0 + $0x16] sm:$0x1]   ;;  %s357_s6 = smov 69   ;;  %s358_s7 = smov 66   ;;  %v277_v20 = vld [vmem:[%s519_s0 + $0x15] sm:$0x1]  }
   0xb   :  { %37 = vrot.lane.b32.xlu2 %v262_v5, %s344_s23  ;;  %s359_s10 = smov 63   ;;  %v278_v21 = vld [vmem:[%s519_s0 + $0x14] sm:$0x1]   ;;  %v279_v22 = vld [vmem:[%s519_s0 + $0x13] sm:$0x1]   ;;  %s360_s15 = smov 60  }
   0xc   :  { %s361_s16 = smov 57   ;;  %v280_v23 = vld [vmem:[%s519_s0 + $0x12] sm:$0x1]   ;;  %s362_s19 = smov 54   ;;  %v281_v24 = vld [vmem:[%s519_s0 + $0x11] sm:$0x1]  }
   0xd   :  { %v282_v25 = vld [vmem:[%s519_s0 + $0x10] sm:$0x1]   ;;  %s363_s24 = smov 51   ;;  %s364_s25 = smov 48   ;;  %v283_v26 = vld [vmem:[%s519_s0 + $0xf] sm:$0x1]  }
   0xe   :  { %v284_v27 = vld [vmem:[%s519_s0 + $0xe] sm:$0x1]   ;;  %v285_v28 = vld [vmem:[%s519_s0 + $0xd] sm:$0x1]   ;;  %s366_s4 = smov 42   ;;  %s367_s5 = smov 39  }
   0xf   :  { %v286_v29 = vld [vmem:[%s519_s0 + $0xc] sm:$0x1]   ;;  %v287_v30 = vld [vmem:[%s519_s0 + $0xb] sm:$0x1]   ;;  %v288_v31 = vld [vmem:[%s519_s0 + $0xa] sm:$0x1]  }
  0x10   :  { %s369_s13 = smov 33   ;;  %s370_s14 = smov 30   ;;  %v289_v32 = vld [vmem:[%s519_s0 + $0x9] sm:$0x1]   ;;  %v2_v33 = vld [vmem:[%s519_s0] sm:$0x1]  }
  0x11   :  { %4 = vst.msk [vmem:[#allocation0] sm:$0x1] %vm3_vm0, %v2_v33   ;;  %v290_v34 = vld [vmem:[%s519_s0 + $0x8] sm:$0x1]   ;;  %v291_v35 = vld [vmem:[%s519_s0 + $0x7] sm:$0x1]  }
  0x12   :  { %43 = vrot.lane.b32.xlu0 %v263_v6, %s345_s28  ;;  %49 = vrot.lane.b32.xlu1 %v264_v7, %s346_s29  ;;  %s365_s28 = smov 45   ;;  %v292_v36 = vld [vmem:[%s519_s0 + $0x6] sm:$0x1]   ;;  %v293_v37 = vld [vmem:[%s519_s0 + $0x5] sm:$0x1]   ;;  %vm27_vm4 = vcmask 958352  }
  0x13   :  { %55 = vrot.lane.b32.xlu2 %v265_v8, %s347_s3  ;;  %v294_v38 = vld [vmem:[%s519_s0 + $0x4] sm:$0x1]   ;;  %v295_v40 = vld [vmem:[%s519_s0 + $0x3] sm:$0x1]   ;;  %v296_v41 = vld [vmem:[%s519_s0 + $0x2] sm:$0x1]  }
  0x14   :  { %v297_v42 = vld [vmem:[%s519_s0 + $0x1] sm:$0x1]   ;;  %s378_s0 = smov 6   ;;  %vm33_vm5 = vcmask 933752   ;;  %vm39_vm6 = vcmask 909152   ;;  %vm45_vm7 = vcmask 884552  }
  0x15   :  { %vm51_vm8 = vcmask 859952   ;;  %vm57_vm9 = vcmask 835352   ;;  %vm63_vm10 = vcmask 810752   ;;  %vm69_vm11 = vcmask 786152  }
  0x16   :  { %vm75_vm12 = vcmask 761552   ;;  %vm81_vm13 = vcmask 736952   ;;  %vm87_vm14 = vcmask 712352   ;;  %vm93_vm15 = vcmask 687752  }
  0x17   :  { %vm99_vm0 = vcmask 663152  }
  0x1a   :  { %61 = vrot.lane.b32.xlu0 %v266_v9, %s348_s8  ;;  %67 = vrot.lane.b32.xlu1 %v267_v10, %s349_s9  ;;  %s368_s8 = smov 36  }
  0x1b   :  { %73 = vrot.lane.b32.xlu2 %v268_v11, %s350_s12 }
  0x22   :  { %79 = vrot.lane.b32.xlu0 %v269_v12, %s351_s17  ;;  %85 = vrot.lane.b32.xlu1 %v270_v13, %s352_s18 }
  0x23   :  { %91 = vrot.lane.b32.xlu2 %v271_v14, %s353_s21 }
  0x2a   :  { %97 = vrot.lane.b32.xlu0 %v272_v15, %s354_s26  ;;  %103 = vrot.lane.b32.xlu1 %v273_v16, %s355_s27 }
  0x2b   :  { %109 = vrot.lane.b32.xlu2 %v274_v17, %s356_s30 }
  0x32   :  { %115 = vrot.lane.b32.xlu0 %v275_v18, %s357_s6  ;;  %121 = vrot.lane.b32.xlu1 %v276_v19, %s358_s7 }
  0x33   :  { %127 = vrot.lane.b32.xlu2 %v277_v20, %s359_s10 }
  0x3a   :  { %133 = vrot.lane.b32.xlu0 %v278_v21, %s360_s15  ;;  %139 = vrot.lane.b32.xlu1 %v279_v22, %s361_s16 }
  0x3b   :  { %145 = vrot.lane.b32.xlu2 %v280_v23, %s362_s19  ;;  %s371_s19 = smov 27  }
  0x42   :  { %151 = vrot.lane.b32.xlu0 %v281_v24, %s363_s24  ;;  %157 = vrot.lane.b32.xlu1 %v282_v25, %s364_s25  ;;  %s372_s24 = smov 24   ;;  %s373_s25 = smov 21  }
  0x43   :  { %163 = vrot.lane.b32.xlu2 %v283_v26, %s365_s28  ;;  %s374_s28 = smov 18  }
  0x4a   :  { %169 = vrot.lane.b32.xlu0 %v284_v27, %s366_s4  ;;  %175 = vrot.lane.b32.xlu1 %v285_v28, %s367_s5  ;;  %s375_s4 = smov 15   ;;  %s376_s5 = smov 12  }
  0x4b   :  { %181 = vrot.lane.b32.xlu2 %v286_v29, %s368_s8  ;;  %s377_s8 = smov 9  }
  0x52   :  { %187 = vrot.lane.b32.xlu0 %v287_v30, %s369_s13  ;;  %193 = vrot.lane.b32.xlu1 %v288_v31, %s370_s14  ;;  %s379_s13 = smov 3  }
  0x53   :  { %199 = vrot.lane.b32.xlu2 %v289_v32, %s371_s19 }
  0x5a   :  { %205 = vrot.lane.b32.xlu0 %v290_v34, %s372_s24  ;;  %211 = vrot.lane.b32.xlu1 %v291_v35, %s373_s25 }
  0x5b   :  { %217 = vrot.lane.b32.xlu2 %v292_v36, %s374_s28 }
  0x5d   :  { %v32_v39 = vpop.permute.xlu2 %31  }
  0x62   :  { %223 = vrot.lane.b32.xlu0 %v293_v37, %s375_s4  ;;  %229 = vrot.lane.b32.xlu1 %v294_v38, %s376_s5 }
  0x63   :  { %235 = vrot.lane.b32.xlu2 %v295_v40, %s377_s8 }
  0x65   :  { %v38_v43 = vpop.permute.xlu2 %37  }
  0x6a   :  { %241 = vrot.lane.b32.xlu0 %v296_v41, %s378_s0  ;;  %247 = vrot.lane.b32.xlu1 %v297_v42, %s379_s13 }
  0x6d   :  { %v56_v44 = vpop.permute.xlu2 %55  }
  0x74   :  { %v8_v45 = vpop.permute.xlu0 %7   ;;  %v20_v46 = vpop.permute.xlu1 %19  }
  0x75   :  { %10 = vst.msk [vmem:[#allocation0] sm:$0x1] %vm9_vm1, %v8_v45   ;;  %v74_v47 = vpop.permute.xlu2 %73   ;;  %vm105_vm1 = vcmask 638552  }
  0x7c   :  { %v14_v48 = vpop.permute.xlu0 %13   ;;  %v26_v49 = vpop.permute.xlu1 %25  }
  0x7d   :  { %16 = vst.msk [vmem:[#allocation0] sm:$0x1] %vm15_vm2, %v14_v48   ;;  %v92_v50 = vpop.permute.xlu2 %91   ;;  %vm111_vm2 = vcmask 613952  }
  0x7e   :  { %22 = vst.msk [vmem:[#allocation0] sm:$0x1] %vm21_vm3, %v20_v46   ;;  %vm117_vm3 = vcmask 589352  }
  0x7f   :  { %28 = vst.msk [vmem:[#allocation0] sm:$0x1] %vm27_vm4, %v26_v49   ;;  %vm123_vm4 = vcmask 564752  }
  0x80   :  { %34 = vst.msk [vmem:[#allocation0] sm:$0x1] %vm33_vm5, %v32_v39   ;;  %vm129_vm5 = vcmask 540152  }
  0x81   :  { %40 = vst.msk [vmem:[#allocation0] sm:$0x1] %vm39_vm6, %v38_v43   ;;  %vm135_vm6 = vcmask 515552  }
  0x84   :  { %v44_v51 = vpop.permute.xlu0 %43   ;;  %v50_v52 = vpop.permute.xlu1 %49  }
  0x85   :  { %46 = vst.msk [vmem:[#allocation0] sm:$0x1] %vm45_vm7, %v44_v51   ;;  %v110_v53 = vpop.permute.xlu2 %109   ;;  %vm141_vm7 = vcmask 490952  }
  0x86   :  { %52 = vst.msk [vmem:[#allocation0] sm:$0x1] %vm51_vm8, %v50_v52   ;;  %vm147_vm8 = vcmask 466352  }
  0x87   :  { %58 = vst.msk [vmem:[#allocation0] sm:$0x1] %vm57_vm9, %v56_v44   ;;  %vm153_vm9 = vcmask 441752  }
  0x8c   :  { %v62_v54 = vpop.permute.xlu0 %61   ;;  %v68_v55 = vpop.permute.xlu1 %67  }
  0x8d   :  { %64 = vst.msk [vmem:[#allocation0] sm:$0x1] %vm63_vm10, %v62_v54   ;;  %v128_v56 = vpop.permute.xlu2 %127   ;;  %vm159_vm10 = vcmask 417152  }
  0x8e   :  { %70 = vst.msk [vmem:[#allocation0] sm:$0x1] %vm69_vm11, %v68_v55   ;;  %vm165_vm11 = vcmask 392552  }
  0x8f   :  { %76 = vst.msk [vmem:[#allocation0] sm:$0x1] %vm75_vm12, %v74_v47   ;;  %vm171_vm12 = vcmask 367952  }
  0x94   :  { %v80_v57 = vpop.permute.xlu0 %79   ;;  %v86_v58 = vpop.permute.xlu1 %85  }
  0x95   :  { %82 = vst.msk [vmem:[#allocation0] sm:$0x1] %vm81_vm13, %v80_v57   ;;  %v146_v59 = vpop.permute.xlu2 %145   ;;  %vm177_vm13 = vcmask 343352  }
  0x96   :  { %88 = vst.msk [vmem:[#allocation0] sm:$0x1] %vm87_vm14, %v86_v58   ;;  %vm183_vm14 = vcmask 318752  }
  0x97   :  { %94 = vst.msk [vmem:[#allocation0] sm:$0x1] %vm93_vm15, %v92_v50   ;;  %vm189_vm15 = vcmask 294152  }
  0x9c   :  { %v98_v60 = vpop.permute.xlu0 %97   ;;  %v104_v61 = vpop.permute.xlu1 %103  }
  0x9d   :  { %100 = vst.msk [vmem:[#allocation0] sm:$0x1] %vm99_vm0, %v98_v60   ;;  %v164_v62 = vpop.permute.xlu2 %163   ;;  %vm195_vm0 = vcmask 269552  }
  0x9e   :  { %106 = vst.msk [vmem:[#allocation0] sm:$0x1] %vm105_vm1, %v104_v61   ;;  %vm201_vm1 = vcmask 244952  }
  0x9f   :  { %112 = vst.msk [vmem:[#allocation0] sm:$0x1] %vm111_vm2, %v110_v53   ;;  %vm207_vm2 = vcmask 220352  }
  0xa4   :  { %v116_v63 = vpop.permute.xlu0 %115   ;;  %v122_v0 = vpop.permute.xlu1 %121  }
  0xa5   :  { %118 = vst.msk [vmem:[#allocation0] sm:$0x1] %vm117_vm3, %v116_v63   ;;  %v182_v1 = vpop.permute.xlu2 %181   ;;  %vm213_vm3 = vcmask 195752  }
  0xa6   :  { %124 = vst.msk [vmem:[#allocation0] sm:$0x1] %vm123_vm4, %v122_v0   ;;  %vm219_vm4 = vcmask 171152  }
  0xa7   :  { %130 = vst.msk [vmem:[#allocation0] sm:$0x1] %vm129_vm5, %v128_v56   ;;  %vm225_vm5 = vcmask 146552  }
  0xac   :  { %v134_v2 = vpop.permute.xlu0 %133   ;;  %v140_v3 = vpop.permute.xlu1 %139  }
  0xad   :  { %136 = vst.msk [vmem:[#allocation0] sm:$0x1] %vm135_vm6, %v134_v2   ;;  %v200_v4 = vpop.permute.xlu2 %199   ;;  %vm231_vm6 = vcmask 121952  }
  0xae   :  { %142 = vst.msk [vmem:[#allocation0] sm:$0x1] %vm141_vm7, %v140_v3   ;;  %vm237_vm7 = vcmask 97352  }
  0xaf   :  { %148 = vst.msk [vmem:[#allocation0] sm:$0x1] %vm147_vm8, %v146_v59   ;;  %vm243_vm8 = vcmask 72752  }
  0xb4   :  { %v152_v5 = vpop.permute.xlu0 %151   ;;  %v158_v6 = vpop.permute.xlu1 %157  }
  0xb5   :  { %154 = vst.msk [vmem:[#allocation0] sm:$0x1] %vm153_vm9, %v152_v5   ;;  %v218_v7 = vpop.permute.xlu2 %217   ;;  %vm249_vm9 = vcmask 48152  }
  0xb6   :  { %160 = vst.msk [vmem:[#allocation0] sm:$0x1] %vm159_vm10, %v158_v6  }
  0xb7   :  { %166 = vst.msk [vmem:[#allocation0] sm:$0x1] %vm165_vm11, %v164_v62  }
  0xbc   :  { %v170_v8 = vpop.permute.xlu0 %169   ;;  %v176_v9 = vpop.permute.xlu1 %175  }
  0xbd   :  { %172 = vst.msk [vmem:[#allocation0] sm:$0x1] %vm171_vm12, %v170_v8   ;;  %v236_v10 = vpop.permute.xlu2 %235  }
  0xbe   :  { %178 = vst.msk [vmem:[#allocation0] sm:$0x1] %vm177_vm13, %v176_v9  }
  0xbf   :  { %184 = vst.msk [vmem:[#allocation0] sm:$0x1] %vm183_vm14, %v182_v1  }
  0xc4   :  { %v188_v11 = vpop.permute.xlu0 %187   ;;  %v194_v12 = vpop.permute.xlu1 %193  }
  0xc5   :  { %190 = vst.msk [vmem:[#allocation0] sm:$0x1] %vm189_vm15, %v188_v11  }
  0xc6   :  { %196 = vst.msk [vmem:[#allocation0] sm:$0x1] %vm195_vm0, %v194_v12  }
  0xc7   :  { %202 = vst.msk [vmem:[#allocation0] sm:$0x1] %vm201_vm1, %v200_v4  }
  0xcc   :  { %v206_v13 = vpop.permute.xlu0 %205   ;;  %v212_v14 = vpop.permute.xlu1 %211  }
  0xcd   :  { %208 = vst.msk [vmem:[#allocation0] sm:$0x1] %vm207_vm2, %v206_v13  }
  0xce   :  { %214 = vst.msk [vmem:[#allocation0] sm:$0x1] %vm213_vm3, %v212_v14  }
  0xcf   :  { %220 = vst.msk [vmem:[#allocation0] sm:$0x1] %vm219_vm4, %v218_v7  }
  0xd4   :  { %v224_v15 = vpop.permute.xlu0 %223   ;;  %v230_v16 = vpop.permute.xlu1 %229  }
  0xd5   :  { %226 = vst.msk [vmem:[#allocation0] sm:$0x1] %vm225_vm5, %v224_v15  }
  0xd6   :  { %232 = vst.msk [vmem:[#allocation0] sm:$0x1] %vm231_vm6, %v230_v16  }
  0xd7   :  { %238 = vst.msk [vmem:[#allocation0] sm:$0x1] %vm237_vm7, %v236_v10  }
  0xdc   :  { %v242_v17 = vpop.permute.xlu0 %241   ;;  %v248_v18 = vpop.permute.xlu1 %247  }
  0xdd   :  { %244 = vst.msk [vmem:[#allocation0] sm:$0x1] %vm243_vm8, %v242_v17  }
  0xde   :  { %250 = vst.msk [vmem:[#allocation0] sm:$0x1] %vm249_vm9, %v248_v18  }
  0xe5   :  { %v253_v19 = vld [vmem:[#allocation0] sm:$0x1] }
  0xe6   :  { %256 = vst [vmem:[%s520_s1] sm:$0x1] %v253_v19 }

// kernel: _net_map_forward_impl.1
= control target key start
LH: loop header
LB: loop body
LE: loop exit
PB: predicated region body
PF: predicated region fallthrough
CT: control target
= control target key end

     0   :  { %vm187_vm0 = vcmask 1045504   ;;  %vm90_vm1 = vcmask 1031168   ;;  %vm617_vm2 = vcmask 1043456   ;;  %vm520_vm3 = vcmask 1014784   ;;  %s1633_s1 = inlined_call_operand.vmem [shape: f32[126,252], index: 1, kind: input, shape index: {}]   ;;  %s1634_s0 = inlined_call_operand.vmem [shape: f32[256,126], index: 0, kind: input, shape index: {}]   ;;  %s1635_s3 = inlined_call_operand.vmem [shape: f32[252,126], index: 3, kind: input, shape index: {}]   ;;  %s1636_s2 = inlined_call_operand.vmem [shape: f32[1,252], index: 2, kind: input, shape index: {}]   ;;  %s1637_s4 = inlined_call_operand.vmem [shape: f32[1,126], index: 4, kind: input, shape index: {}]   ;;  %s1638_s5 = inlined_call_operand.vmem [shape: f32[256,126], index: 5, kind: output, shape index: {}]  }
   0x1   :  { %v82_v0 = vld [vmem:[%s1633_s1 + $0xf0] sm:$0x3f]  ;;  %v80_v1 = vld [vmem:[%s1633_s1 + $0xe0] sm:$0xff]  ;;  %v83_v2 = vld [vmem:[%s1633_s1 + $0xf8] sm:$0x3f] }
   0x2   :  { %883 = vmatpush.msk.msra.mxu0 %vm187_vm0, %v82_v0  ;;  %916 = vmatpush.msk.msra.mxu1 %vm187_vm0, %v83_v2  ;;  %v81_v3 = vld [vmem:[%s1633_s1 + $0xe8] sm:$0xff]  ;;  %v78_v4 = vld [vmem:[%s1633_s1 + $0xd0] sm:$0xff]  ;;  %v79_v5 = vld [vmem:[%s1633_s1 + $0xd8] sm:$0xff] }
   0x3   :  { %v76_v6 = vld [vmem:[%s1633_s1 + $0xc0] sm:$0xff]  ;;  %v77_v7 = vld [vmem:[%s1633_s1 + $0xc8] sm:$0xff]  ;;  %v74_v8 = vld [vmem:[%s1633_s1 + $0xb0] sm:$0xff] }
   0x4   :  { %195 = vmatpush.msra.mxu0 %v80_v1  ;;  %308 = vmatpush.msra.mxu1 %v81_v3  ;;  %v75_v9 = vld [vmem:[%s1633_s1 + $0xb8] sm:$0xff]  ;;  %v72_v10 = vld [vmem:[%s1633_s1 + $0xa0] sm:$0xff]  ;;  %v73_v11 = vld [vmem:[%s1633_s1 + $0xa8] sm:$0xff] }
   0x5   :  { %v70_v12 = vld [vmem:[%s1633_s1 + $0x90] sm:$0xff]  ;;  %v71_v13 = vld [vmem:[%s1633_s1 + $0x98] sm:$0xff]  ;;  %v68_v14 = vld [vmem:[%s1633_s1 + $0x80] sm:$0xff] }
   0x6   :  { %196 = vmatpush.msra.mxu0 %v78_v4  ;;  %309 = vmatpush.msra.mxu1 %v79_v5  ;;  %v69_v15 = vld [vmem:[%s1633_s1 + $0x88] sm:$0xff]  ;;  %v66_v16 = vld [vmem:[%s1633_s1 + $0x70] sm:$0xff]  ;;  %v67_v17 = vld [vmem:[%s1633_s1 + $0x78] sm:$0xff] }
   0x7   :  { %v64_v18 = vld [vmem:[%s1633_s1 + $0x60] sm:$0xff]  ;;  %v65_v19 = vld [vmem:[%s1633_s1 + $0x68] sm:$0xff]  ;;  %v62_v20 = vld [vmem:[%s1633_s1 + $0x50] sm:$0xff] }
   0x8   :  { %197 = vmatpush.msra.mxu0 %v76_v6  ;;  %310 = vmatpush.msra.mxu1 %v77_v7  ;;  %v63_v21 = vld [vmem:[%s1633_s1 + $0x58] sm:$0xff]  ;;  %v60_v22 = vld [vmem:[%s1633_s1 + $0x40] sm:$0xff]  ;;  %v61_v23 = vld [vmem:[%s1633_s1 + $0x48] sm:$0xff] }
   0x9   :  { %v58_v24 = vld [vmem:[%s1633_s1 + $0x30] sm:$0xff]  ;;  %v59_v25 = vld [vmem:[%s1633_s1 + $0x38] sm:$0xff]  ;;  %v56_v26 = vld [vmem:[%s1633_s1 + $0x20] sm:$0xff] }
   0xa   :  { %198 = vmatpush.msra.mxu0 %v74_v8  ;;  %311 = vmatpush.msra.mxu1 %v75_v9  ;;  %v57_v27 = vld [vmem:[%s1633_s1 + $0x28] sm:$0xff]  ;;  %v54_v28 = vld [vmem:[%s1633_s1 + $0x10] sm:$0xff]  ;;  %v55_v29 = vld [vmem:[%s1633_s1 + $0x18] sm:$0xff] }
   0xb   :  { %v52_v30 = vld [vmem:[%s1633_s1] sm:$0xff]  ;;  %v53_v31 = vld [vmem:[%s1633_s1 + $0x8] sm:$0xff]  ;;  %v22_v34 = vld [vmem:[%s1634_s0 + $0x10] sm:$0xff] }
   0xc   :  { %199 = vmatpush.msra.mxu0 %v72_v10  ;;  %312 = vmatpush.msra.mxu1 %v73_v11  ;;  %v20_v32 = vld [vmem:[%s1634_s0] sm:$0xff]  ;;  %v21_v33 = vld [vmem:[%s1634_s0 + $0x8] sm:$0xff]  ;;  %v23_v35 = vld [vmem:[%s1634_s0 + $0x18] sm:$0xff] }
   0xd   :  { %v24_v36 = vld [vmem:[%s1634_s0 + $0x20] sm:$0xff]  ;;  %v25_v37 = vld [vmem:[%s1634_s0 + $0x28] sm:$0xff]  ;;  %v26_v38 = vld [vmem:[%s1634_s0 + $0x30] sm:$0xff] }
   0xe   :  { %200 = vmatpush.msra.mxu0 %v70_v12  ;;  %313 = vmatpush.msra.mxu1 %v71_v13  ;;  %v27_v39 = vld [vmem:[%s1634_s0 + $0x38] sm:$0xff]  ;;  %v28_v40 = vld [vmem:[%s1634_s0 + $0x40] sm:$0xff]  ;;  %v498_v42 = vld [vmem:[%s1635_s3 + $0x70] sm:$0xff] }
   0xf   :  { %v499_v41 = vld [vmem:[%s1635_s3 + $0x78] sm:$0xff]  ;;  %v514_v44 = vld [vmem:[%s1635_s3 + $0xf0] sm:$0xff]  ;;  %v497_v45 = vld [vmem:[%s1635_s3 + $0x68] sm:$0xff] }
  0x10   :  { %201 = vmatpush.msra.mxu0 %v68_v14  ;;  %314 = vmatpush.msra.mxu1 %v69_v15  ;;  %v515_v43 = vld [vmem:[%s1635_s3 + $0xf8] sm:$0xf]  ;;  %v29_v46 = vld [vmem:[%s1634_s0 + $0x48] sm:$0xff]  ;;  %v496_v47 = vld [vmem:[%s1635_s3 + $0x60] sm:$0xff] }
  0x11   :  { %621 = vmatpush.msra.mxu2 %v499_v41  ;;  %949 = vmatpush.msk.msra.mxu3 %vm617_vm2, %v515_v43  ;;  %v513_v48 = vld [vmem:[%s1635_s3 + $0xe8] sm:$0xff]  ;;  %v495_v49 = vld [vmem:[%s1635_s3 + $0x58] sm:$0xff]  ;;  %v512_v50 = vld [vmem:[%s1635_s3 + $0xe0] sm:$0xff] }
  0x12   :  { %202 = vmatpush.msra.mxu0 %v66_v16  ;;  %315 = vmatpush.msra.mxu1 %v67_v17  ;;  %v494_v51 = vld [vmem:[%s1635_s3 + $0x50] sm:$0xff]  ;;  %v511_v52 = vld [vmem:[%s1635_s3 + $0xd8] sm:$0xff]  ;;  %v493_v53 = vld [vmem:[%s1635_s3 + $0x48] sm:$0xff] }
  0x13   :  { %622 = vmatpush.msra.mxu2 %v498_v42  ;;  %735 = vmatpush.msra.mxu3 %v514_v44  ;;  %v510_v54 = vld [vmem:[%s1635_s3 + $0xd0] sm:$0xff]  ;;  %v492_v56 = vld [vmem:[%s1635_s3 + $0x40] sm:$0xff]  ;;  %v509_v57 = vld [vmem:[%s1635_s3 + $0xc8] sm:$0xff] }
  0x14   :  { %203 = vmatpush.msra.mxu0 %v64_v18  ;;  %316 = vmatpush.msra.mxu1 %v65_v19  ;;  %v30_v55 = vld [vmem:[%s1634_s0 + $0x50] sm:$0xff]  ;;  %v491_v58 = vld [vmem:[%s1635_s3 + $0x38] sm:$0xff]  ;;  %v508_v59 = vld [vmem:[%s1635_s3 + $0xc0] sm:$0xff] }
  0x15   :  { %623 = vmatpush.msra.mxu2 %v497_v45  ;;  %736 = vmatpush.msra.mxu3 %v513_v48  ;;  %v490_v60 = vld [vmem:[%s1635_s3 + $0x30] sm:$0xff]  ;;  %v507_v61 = vld [vmem:[%s1635_s3 + $0xb8] sm:$0xff]  ;;  %v489_v62 = vld [vmem:[%s1635_s3 + $0x28] sm:$0xff] }
  0x16   :  { %204 = vmatpush.msra.mxu0 %v62_v20  ;;  %317 = vmatpush.msra.mxu1 %v63_v21  ;;  %v506_v63 = vld [vmem:[%s1635_s3 + $0xb0] sm:$0xff]  ;;  %v31_v0 = vld [vmem:[%s1634_s0 + $0x58] sm:$0xff]  ;;  %v488_v1 = vld [vmem:[%s1635_s3 + $0x20] sm:$0xff] }
  0x17   :  { %624 = vmatpush.msra.mxu2 %v496_v47  ;;  %737 = vmatpush.msra.mxu3 %v512_v50  ;;  %v505_v2 = vld [vmem:[%s1635_s3 + $0xa8] sm:$0xff]  ;;  %v487_v3 = vld [vmem:[%s1635_s3 + $0x18] sm:$0xff]  ;;  %v504_v4 = vld [vmem:[%s1635_s3 + $0xa0] sm:$0xff] }
  0x18   :  { %205 = vmatpush.msra.mxu0 %v60_v22  ;;  %318 = vmatpush.msra.mxu1 %v61_v23  ;;  %v486_v5 = vld [vmem:[%s1635_s3 + $0x10] sm:$0xff]  ;;  %v503_v6 = vld [vmem:[%s1635_s3 + $0x98] sm:$0xff]  ;;  %v32_v7 = vld [vmem:[%s1634_s0 + $0x60] sm:$0xff] }
  0x19   :  { %625 = vmatpush.msra.mxu2 %v495_v49  ;;  %738 = vmatpush.msra.mxu3 %v511_v52  ;;  %v485_v8 = vld [vmem:[%s1635_s3 + $0x8] sm:$0xff]  ;;  %v502_v9 = vld [vmem:[%s1635_s3 + $0x90] sm:$0xff]  ;;  %v484_v10 = vld [vmem:[%s1635_s3] sm:$0xff] }
  0x1a   :  { %206 = vmatpush.msra.mxu0 %v58_v24  ;;  %319 = vmatpush.msra.mxu1 %v59_v25  ;;  %v501_v11 = vld [vmem:[%s1635_s3 + $0x88] sm:$0xff]  ;;  %v500_v12 = vld [vmem:[%s1635_s3 + $0x80] sm:$0xff]  ;;  %v34_v14 = vld [vmem:[%s1634_s0 + $0x70] sm:$0xff] }
  0x1b   :  { %626 = vmatpush.msra.mxu2 %v494_v51  ;;  %739 = vmatpush.msra.mxu3 %v510_v54  ;;  %v33_v13 = vld [vmem:[%s1634_s0 + $0x68] sm:$0xff]  ;;  %v35_v15 = vld [vmem:[%s1634_s0 + $0x78] sm:$0xff]  ;;  %v84_v16 = vld [vmem:[%s1636_s2] sm:$0x3] }
  0x1c   :  { %207 = vmatpush.msra.mxu0 %v56_v26  ;;  %320 = vmatpush.msra.mxu1 %v57_v27  ;;  %v1288_v17 = vperm.slane %v84_v16, 0  ;;  %v1290_v18 = vperm.slane %v84_v16, 1  ;;  %v36_v21 = vld [vmem:[%s1634_s0 + $0x80] sm:$0xff]  ;;  %v39_v42 = vld [vmem:[%s1634_s0 + $0x98] sm:$0xff] }
  0x1d   :  { %627 = vmatpush.msra.mxu2 %v493_v53  ;;  %740 = vmatpush.msra.mxu3 %v509_v57  ;;  %v40_v49 = vld [vmem:[%s1634_s0 + $0xa0] sm:$0xff] }
  0x1e   :  { %208 = vmatpush.msra.mxu0 %v54_v28  ;;  %321 = vmatpush.msra.mxu1 %v55_v29  ;;  %v37_v28 = vld [vmem:[%s1634_s0 + $0x88] sm:$0xff] }
  0x1f   :  { %628 = vmatpush.msra.mxu2 %v492_v56  ;;  %741 = vmatpush.msra.mxu3 %v508_v59  ;;  %v41_v56 = vld [vmem:[%s1634_s0 + $0xa8] sm:$0xff] }
  0x20   :  { %209 = vmatpush.msra.mxu0 %v52_v30  ;;  %322 = vmatpush.msra.mxu1 %v53_v31 }
  0x21   :  { %884 = vmatmul.msk.f32.vlgmr.msra.gmra.mxu0 %vm90_vm1, %v20_v32  ;;  %917 = vmatmul.msk.f32.vlgmr.msra.gmra.mxu1 %vm90_vm1, %v20_v32 }
  0x22   :  { %629 = vmatpush.msra.mxu2 %v491_v58  ;;  %742 = vmatpush.msra.mxu3 %v507_v61 }
  0x24   :  { %630 = vmatpush.msra.mxu2 %v490_v60  ;;  %743 = vmatpush.msra.mxu3 %v506_v63  ;;  %v42_v63 = vld [vmem:[%s1634_s0 + $0xb0] sm:$0xff] }
  0x26   :  { %631 = vmatpush.msra.mxu2 %v489_v62  ;;  %744 = vmatpush.msra.mxu3 %v505_v2 }
  0x28   :  { %632 = vmatpush.msra.mxu2 %v488_v1  ;;  %745 = vmatpush.msra.mxu3 %v504_v4 }
  0x29   :  { %885 = vmatmul.msk.f32.gmra.mxu0 %vm90_vm1, %v21_v33  ;;  %918 = vmatmul.msk.f32.gmra.mxu1 %vm90_vm1, %v21_v33 }
  0x2a   :  { %633 = vmatpush.msra.mxu2 %v487_v3  ;;  %746 = vmatpush.msra.mxu3 %v503_v6  ;;  %v43_v6 = vld [vmem:[%s1634_s0 + $0xb8] sm:$0xff] }
  0x2c   :  { %634 = vmatpush.msra.mxu2 %v486_v5  ;;  %747 = vmatpush.msra.mxu3 %v502_v9 }
  0x2e   :  { %635 = vmatpush.msra.mxu2 %v485_v8  ;;  %748 = vmatpush.msra.mxu3 %v501_v11 }
  0x30   :  { %636 = vmatpush.msra.mxu2 %v484_v10  ;;  %749 = vmatpush.msra.mxu3 %v500_v12 }
  0x31   :  { %886 = vmatmul.msk.f32.gmra.mxu0 %vm90_vm1, %v22_v34  ;;  %919 = vmatmul.msk.f32.gmra.mxu1 %vm90_vm1, %v22_v34 }
  0x39   :  { %887 = vmatmul.msk.f32.gmra.mxu0 %vm90_vm1, %v23_v35  ;;  %920 = vmatmul.msk.f32.gmra.mxu1 %vm90_vm1, %v23_v35  ;;  %v38_v35 = vld [vmem:[%s1634_s0 + $0x90] sm:$0xff] }
  0x41   :  { %888 = vmatmul.msk.f32.gmra.mxu0 %vm90_vm1, %v24_v36  ;;  %921 = vmatmul.msk.f32.gmra.mxu1 %vm90_vm1, %v24_v36 }
  0x49   :  { %889 = vmatmul.msk.f32.gmra.mxu0 %vm90_vm1, %v25_v37  ;;  %922 = vmatmul.msk.f32.gmra.mxu1 %vm90_vm1, %v25_v37 }
  0x51   :  { %890 = vmatmul.msk.f32.gmra.mxu0 %vm90_vm1, %v26_v38  ;;  %923 = vmatmul.msk.f32.gmra.mxu1 %vm90_vm1, %v26_v38 }
  0x59   :  { %891 = vmatmul.msk.f32.gmra.mxu0 %vm90_vm1, %v27_v39  ;;  %924 = vmatmul.msk.f32.gmra.mxu1 %vm90_vm1, %v27_v39 }
  0x61   :  { %892 = vmatmul.msk.f32.gmra.mxu0 %vm90_vm1, %v28_v40  ;;  %925 = vmatmul.msk.f32.gmra.mxu1 %vm90_vm1, %v28_v40 }
  0x69   :  { %893 = vmatmul.msk.f32.gmra.mxu0 %vm90_vm1, %v29_v46  ;;  %926 = vmatmul.msk.f32.gmra.mxu1 %vm90_vm1, %v29_v46 }
  0x71   :  { %894 = vmatmul.msk.f32.gmra.mxu0 %vm90_vm1, %v30_v55  ;;  %927 = vmatmul.msk.f32.gmra.mxu1 %vm90_vm1, %v30_v55 }
  0x79   :  { %895 = vmatmul.msk.f32.gmra.mxu0 %vm90_vm1, %v31_v0  ;;  %928 = vmatmul.msk.f32.gmra.mxu1 %vm90_vm1, %v31_v0 }
  0x81   :  { %896 = vmatmul.msk.f32.gmra.mxu0 %vm90_vm1, %v32_v7  ;;  %929 = vmatmul.msk.f32.gmra.mxu1 %vm90_vm1, %v32_v7 }
  0x89   :  { %897 = vmatmul.msk.f32.gmra.mxu0 %vm90_vm1, %v33_v13  ;;  %930 = vmatmul.msk.f32.gmra.mxu1 %vm90_vm1, %v33_v13  ;;  %v44_v13 = vld [vmem:[%s1634_s0 + $0xc0] sm:$0xff] }
  0x91   :  { %898 = vmatmul.msk.f32.gmra.mxu0 %vm90_vm1, %v34_v14  ;;  %931 = vmatmul.msk.f32.gmra.mxu1 %vm90_vm1, %v34_v14 }
  0x99   :  { %899 = vmatmul.msk.f32.gmra.mxu0 %vm90_vm1, %v35_v15  ;;  %932 = vmatmul.msk.f32.gmra.mxu1 %vm90_vm1, %v35_v15 }
  0x9e   :  { %v211_v19 = vpop.f32.mrf.mxu0  ;;  %v324_v20 = vpop.f32.mrf.mxu1 }
  0x9f   :  { %v212_v22 = vadd.f32 %v211_v19, %v1288_v17  ;;  %v325_v23 = vadd.f32 %v324_v20, %v1290_v18 }
  0xa1   :  { %v421_v24 = vmax.f32 %v325_v23, 0.0  ;;  %900 = vmatmul.msk.f32.gmra.mxu0 %vm90_vm1, %v36_v21  ;;  %933 = vmatmul.msk.f32.gmra.mxu1 %vm90_vm1, %v36_v21  ;;  %v420_v25 = vmax.f32 %v212_v22, 0.0  ;;  %v45_v22 = vld [vmem:[%s1634_s0 + $0xc8] sm:$0xff] }
  0xa3   :  { %637 = vmatmul.f32.vlgmr.msra.gmra.mxu2 %v420_v25  ;;  %950 = vmatmul.msk.f32.vlgmr.msra.gmra.mxu3 %vm520_vm3, %v421_v24 }
  0xa6   :  { %v214_v26 = vpop.f32.mrf.mxu0  ;;  %v327_v27 = vpop.f32.mrf.mxu1 }
  0xa7   :  { %v215_v29 = vadd.f32 %v214_v26, %v1288_v17  ;;  %v328_v30 = vadd.f32 %v327_v27, %v1290_v18 }
  0xa9   :  { %v423_v31 = vmax.f32 %v328_v30, 0.0  ;;  %901 = vmatmul.msk.f32.gmra.mxu0 %vm90_vm1, %v37_v28  ;;  %934 = vmatmul.msk.f32.gmra.mxu1 %vm90_vm1, %v37_v28  ;;  %v422_v32 = vmax.f32 %v215_v29, 0.0  ;;  %v46_v29 = vld [vmem:[%s1634_s0 + $0xd0] sm:$0xff] }
  0xab   :  { %640 = vmatmul.f32.gmra.mxu2 %v422_v32  ;;  %951 = vmatmul.msk.f32.gmra.mxu3 %vm520_vm3, %v423_v31 }
  0xae   :  { %v217_v33 = vpop.f32.mrf.mxu0  ;;  %v330_v34 = vpop.f32.mrf.mxu1 }
  0xaf   :  { %v218_v36 = vadd.f32 %v217_v33, %v1288_v17  ;;  %v331_v37 = vadd.f32 %v330_v34, %v1290_v18 }
  0xb1   :  { %v425_v38 = vmax.f32 %v331_v37, 0.0  ;;  %902 = vmatmul.msk.f32.gmra.mxu0 %vm90_vm1, %v38_v35  ;;  %935 = vmatmul.msk.f32.gmra.mxu1 %vm90_vm1, %v38_v35  ;;  %v424_v39 = vmax.f32 %v218_v36, 0.0  ;;  %v47_v36 = vld [vmem:[%s1634_s0 + $0xd8] sm:$0xff] }
  0xb3   :  { %643 = vmatmul.f32.gmra.mxu2 %v424_v39  ;;  %952 = vmatmul.msk.f32.gmra.mxu3 %vm520_vm3, %v425_v38 }
  0xb6   :  { %v220_v40 = vpop.f32.mrf.mxu0  ;;  %v333_v41 = vpop.f32.mrf.mxu1 }
  0xb7   :  { %v221_v43 = vadd.f32 %v220_v40, %v1288_v17  ;;  %v334_v44 = vadd.f32 %v333_v41, %v1290_v18 }
  0xb9   :  { %v427_v45 = vmax.f32 %v334_v44, 0.0  ;;  %903 = vmatmul.msk.f32.gmra.mxu0 %vm90_vm1, %v39_v42  ;;  %936 = vmatmul.msk.f32.gmra.mxu1 %vm90_vm1, %v39_v42  ;;  %v426_v46 = vmax.f32 %v221_v43, 0.0  ;;  %v48_v43 = vld [vmem:[%s1634_s0 + $0xe0] sm:$0xff] }
  0xbb   :  { %646 = vmatmul.f32.gmra.mxu2 %v426_v46  ;;  %953 = vmatmul.msk.f32.gmra.mxu3 %vm520_vm3, %v427_v45 }
  0xbe   :  { %v223_v47 = vpop.f32.mrf.mxu0  ;;  %v336_v48 = vpop.f32.mrf.mxu1 }
  0xbf   :  { %v224_v50 = vadd.f32 %v223_v47, %v1288_v17  ;;  %v337_v51 = vadd.f32 %v336_v48, %v1290_v18 }
  0xc1   :  { %v429_v52 = vmax.f32 %v337_v51, 0.0  ;;  %904 = vmatmul.msk.f32.gmra.mxu0 %vm90_vm1, %v40_v49  ;;  %937 = vmatmul.msk.f32.gmra.mxu1 %vm90_vm1, %v40_v49  ;;  %v428_v53 = vmax.f32 %v224_v50, 0.0  ;;  %v49_v50 = vld [vmem:[%s1634_s0 + $0xe8] sm:$0xff] }
  0xc3   :  { %649 = vmatmul.f32.gmra.mxu2 %v428_v53  ;;  %954 = vmatmul.msk.f32.gmra.mxu3 %vm520_vm3, %v429_v52 }
  0xc6   :  { %v226_v54 = vpop.f32.mrf.mxu0  ;;  %v339_v55 = vpop.f32.mrf.mxu1 }
  0xc7   :  { %v227_v57 = vadd.f32 %v226_v54, %v1288_v17  ;;  %v340_v58 = vadd.f32 %v339_v55, %v1290_v18 }
  0xc9   :  { %v431_v59 = vmax.f32 %v340_v58, 0.0  ;;  %905 = vmatmul.msk.f32.gmra.mxu0 %vm90_vm1, %v41_v56  ;;  %938 = vmatmul.msk.f32.gmra.mxu1 %vm90_vm1, %v41_v56  ;;  %v430_v60 = vmax.f32 %v227_v57, 0.0  ;;  %v50_v57 = vld [vmem:[%s1634_s0 + $0xf0] sm:$0xff] }
  0xcb   :  { %652 = vmatmul.f32.gmra.mxu2 %v430_v60  ;;  %955 = vmatmul.msk.f32.gmra.mxu3 %vm520_vm3, %v431_v59 }
  0xce   :  { %v229_v61 = vpop.f32.mrf.mxu0  ;;  %v342_v62 = vpop.f32.mrf.mxu1 }
  0xcf   :  { %v230_v0 = vadd.f32 %v229_v61, %v1288_v17  ;;  %v343_v1 = vadd.f32 %v342_v62, %v1290_v18 }
  0xd1   :  { %v433_v2 = vmax.f32 %v343_v1, 0.0  ;;  %906 = vmatmul.msk.f32.gmra.mxu0 %vm90_vm1, %v42_v63  ;;  %939 = vmatmul.msk.f32.gmra.mxu1 %vm90_vm1, %v42_v63  ;;  %v432_v3 = vmax.f32 %v230_v0, 0.0  ;;  %v51_v0 = vld [vmem:[%s1634_s0 + $0xf8] sm:$0xff] }
  0xd3   :  { %655 = vmatmul.f32.gmra.mxu2 %v432_v3  ;;  %956 = vmatmul.msk.f32.gmra.mxu3 %vm520_vm3, %v433_v2 }
  0xd6   :  { %v232_v4 = vpop.f32.mrf.mxu0  ;;  %v345_v5 = vpop.f32.mrf.mxu1 }
  0xd7   :  { %v233_v7 = vadd.f32 %v232_v4, %v1288_v17  ;;  %v346_v8 = vadd.f32 %v345_v5, %v1290_v18 }
  0xd9   :  { %v435_v9 = vmax.f32 %v346_v8, 0.0  ;;  %907 = vmatmul.msk.f32.gmra.mxu0 %vm90_vm1, %v43_v6  ;;  %940 = vmatmul.msk.f32.gmra.mxu1 %vm90_vm1, %v43_v6  ;;  %v434_v10 = vmax.f32 %v233_v7, 0.0 }
  0xdb   :  { %658 = vmatmul.f32.gmra.mxu2 %v434_v10  ;;  %957 = vmatmul.msk.f32.gmra.mxu3 %vm520_vm3, %v435_v9 }
  0xde   :  { %v235_v11 = vpop.f32.mrf.mxu0  ;;  %v348_v12 = vpop.f32.mrf.mxu1 }
  0xdf   :  { %v236_v14 = vadd.f32 %v235_v11, %v1288_v17  ;;  %v349_v15 = vadd.f32 %v348_v12, %v1290_v18  ;;  %v1426_v11 = vld [vmem:[%s1637_s4] ss:$0 sm:$0xff] }
  0xe1   :  { %v436_v16 = vmax.f32 %v236_v14, 0.0  ;;  %v437_v19 = vmax.f32 %v349_v15, 0.0  ;;  %908 = vmatmul.msk.f32.gmra.mxu0 %vm90_vm1, %v44_v13  ;;  %941 = vmatmul.msk.f32.gmra.mxu1 %vm90_vm1, %v44_v13 }
  0xe3   :  { %661 = vmatmul.f32.gmra.mxu2 %v436_v16  ;;  %958 = vmatmul.msk.f32.gmra.mxu3 %vm520_vm3, %v437_v19 }
  0xe6   :  { %v238_v20 = vpop.f32.mrf.mxu0  ;;  %v351_v21 = vpop.f32.mrf.mxu1 }
  0xe7   :  { %v239_v23 = vadd.f32 %v238_v20, %v1288_v17  ;;  %v352_v24 = vadd.f32 %v351_v21, %v1290_v18 }
  0xe9   :  { %v438_v25 = vmax.f32 %v239_v23, 0.0  ;;  %v439_v26 = vmax.f32 %v352_v24, 0.0  ;;  %909 = vmatmul.msk.f32.gmra.mxu0 %vm90_vm1, %v45_v22  ;;  %942 = vmatmul.msk.f32.gmra.mxu1 %vm90_vm1, %v45_v22 }
  0xeb   :  { %664 = vmatmul.f32.gmra.mxu2 %v438_v25  ;;  %959 = vmatmul.msk.f32.gmra.mxu3 %vm520_vm3, %v439_v26 }
  0xee   :  { %v241_v27 = vpop.f32.mrf.mxu0  ;;  %v354_v28 = vpop.f32.mrf.mxu1 }
  0xef   :  { %v242_v30 = vadd.f32 %v241_v27, %v1288_v17  ;;  %v355_v31 = vadd.f32 %v354_v28, %v1290_v18 }
  0xf1   :  { %v440_v32 = vmax.f32 %v242_v30, 0.0  ;;  %v441_v33 = vmax.f32 %v355_v31, 0.0  ;;  %910 = vmatmul.msk.f32.gmra.mxu0 %vm90_vm1, %v46_v29  ;;  %943 = vmatmul.msk.f32.gmra.mxu1 %vm90_vm1, %v46_v29 }
  0xf3   :  { %667 = vmatmul.f32.gmra.mxu2 %v440_v32  ;;  %960 = vmatmul.msk.f32.gmra.mxu3 %vm520_vm3, %v441_v33 }
  0xf6   :  { %v244_v34 = vpop.f32.mrf.mxu0  ;;  %v357_v35 = vpop.f32.mrf.mxu1 }
  0xf7   :  { %v245_v37 = vadd.f32 %v244_v34, %v1288_v17  ;;  %v358_v38 = vadd.f32 %v357_v35, %v1290_v18 }
  0xf9   :  { %v442_v39 = vmax.f32 %v245_v37, 0.0  ;;  %v443_v40 = vmax.f32 %v358_v38, 0.0  ;;  %911 = vmatmul.msk.f32.gmra.mxu0 %vm90_vm1, %v47_v36  ;;  %944 = vmatmul.msk.f32.gmra.mxu1 %vm90_vm1, %v47_v36 }
  0xfb   :  { %670 = vmatmul.f32.gmra.mxu2 %v442_v39  ;;  %961 = vmatmul.msk.f32.gmra.mxu3 %vm520_vm3, %v443_v40 }
  0xfe   :  { %v247_v41 = vpop.f32.mrf.mxu0  ;;  %v360_v42 = vpop.f32.mrf.mxu1 }
  0xff   :  { %v248_v44 = vadd.f32 %v247_v41, %v1288_v17  ;;  %v361_v45 = vadd.f32 %v360_v42, %v1290_v18 }
 0x101   :  { %v444_v46 = vmax.f32 %v248_v44, 0.0  ;;  %v445_v47 = vmax.f32 %v361_v45, 0.0  ;;  %912 = vmatmul.msk.f32.gmra.mxu0 %vm90_vm1, %v48_v43  ;;  %945 = vmatmul.msk.f32.gmra.mxu1 %vm90_vm1, %v48_v43 }
 0x103   :  { %673 = vmatmul.f32.gmra.mxu2 %v444_v46  ;;  %962 = vmatmul.msk.f32.gmra.mxu3 %vm520_vm3, %v445_v47 }
 0x106   :  { %v250_v48 = vpop.f32.mrf.mxu0  ;;  %v363_v49 = vpop.f32.mrf.mxu1 }
 0x107   :  { %v251_v51 = vadd.f32 %v250_v48, %v1288_v17  ;;  %v364_v52 = vadd.f32 %v363_v49, %v1290_v18 }
 0x109   :  { %v446_v53 = vmax.f32 %v251_v51, 0.0  ;;  %v447_v54 = vmax.f32 %v364_v52, 0.0  ;;  %913 = vmatmul.msk.f32.gmra.mxu0 %vm90_vm1, %v49_v50  ;;  %946 = vmatmul.msk.f32.gmra.mxu1 %vm90_vm1, %v49_v50 }
 0x10b   :  { %676 = vmatmul.f32.gmra.mxu2 %v446_v53  ;;  %963 = vmatmul.msk.f32.gmra.mxu3 %vm520_vm3, %v447_v54 }
 0x10e   :  { %v253_v55 = vpop.f32.mrf.mxu0  ;;  %v366_v56 = vpop.f32.mrf.mxu1 }
 0x10f   :  { %v254_v58 = vadd.f32 %v253_v55, %v1288_v17  ;;  %v367_v59 = vadd.f32 %v366_v56, %v1290_v18 }
 0x111   :  { %v448_v60 = vmax.f32 %v254_v58, 0.0  ;;  %v449_v61 = vmax.f32 %v367_v59, 0.0  ;;  %914 = vmatmul.msk.f32.gmra.mxu0 %vm90_vm1, %v50_v57  ;;  %947 = vmatmul.msk.f32.gmra.mxu1 %vm90_vm1, %v50_v57 }
 0x113   :  { %679 = vmatmul.f32.gmra.mxu2 %v448_v60  ;;  %964 = vmatmul.msk.f32.gmra.mxu3 %vm520_vm3, %v449_v61 }
 0x116   :  { %v256_v62 = vpop.f32.mrf.mxu0  ;;  %v369_v63 = vpop.f32.mrf.mxu1 }
 0x117   :  { %v257_v1 = vadd.f32 %v256_v62, %v1288_v17  ;;  %v370_v2 = vadd.f32 %v369_v63, %v1290_v18 }
 0x119   :  { %v450_v3 = vmax.f32 %v257_v1, 0.0  ;;  %v451_v4 = vmax.f32 %v370_v2, 0.0  ;;  %915 = vmatmul.msk.f32.gmra.mxu0 %vm90_vm1, %v51_v0  ;;  %948 = vmatmul.msk.f32.gmra.mxu1 %vm90_vm1, %v51_v0 }
 0x11b   :  { %682 = vmatmul.f32.gmra.mxu2 %v450_v3  ;;  %965 = vmatmul.msk.f32.gmra.mxu3 %vm520_vm3, %v451_v4 }
 0x11e   :  { %v259_v5 = vpop.f32.mrf.mxu0  ;;  %v372_v6 = vpop.f32.mrf.mxu1 }
 0x11f   :  { %v260_v7 = vadd.f32 %v259_v5, %v1288_v17  ;;  %v373_v8 = vadd.f32 %v372_v6, %v1290_v18 }
 0x121   :  { %v452_v9 = vmax.f32 %v260_v7, 0.0  ;;  %v453_v10 = vmax.f32 %v373_v8, 0.0 }
 0x123   :  { %685 = vmatmul.f32.gmra.mxu2 %v452_v9  ;;  %966 = vmatmul.msk.f32.gmra.mxu3 %vm520_vm3, %v453_v10 }
 0x126   :  { %v262_v12 = vpop.f32.mrf.mxu0  ;;  %v638_v13 = vpop.f32.mrf.mxu2 }
 0x127   :  { %v263_v14 = vadd.f32 %v262_v12, %v1288_v17  ;;  %v639_v15 = vadd.f32 %v1426_v11, %v638_v13  ;;  %v375_v16 = vpop.f32.mrf.mxu1  ;;  %v751_v19 = vpop.f32.mrf.mxu3 }
 0x128   :  { %v376_v20 = vadd.f32 %v375_v16, %v1290_v18 }
 0x129   :  { %v454_v21 = vmax.f32 %v263_v14, 0.0  ;;  %v752_v22 = vadd.f32 %v751_v19, %v639_v15 }
 0x12a   :  { %v455_v23 = vmax.f32 %v376_v20, 0.0 }
 0x12b   :  { %847 = vst.msk [vmem:[%s1638_s5] sm:$0xff] %vm90_vm1, %v752_v22  ;;  %688 = vmatmul.f32.gmra.mxu2 %v454_v21 }
 0x12c   :  { %967 = vmatmul.msk.f32.gmra.mxu3 %vm520_vm3, %v455_v23 }
 0x12e   :  { %v265_v24 = vpop.f32.mrf.mxu0  ;;  %v641_v25 = vpop.f32.mrf.mxu2 }
 0x12f   :  { %v266_v26 = vadd.f32 %v265_v24, %v1288_v17  ;;  %v642_v27 = vadd.f32 %v1426_v11, %v641_v25  ;;  %v378_v28 = vpop.f32.mrf.mxu1  ;;  %v754_v29 = vpop.f32.mrf.mxu3 }
 0x130   :  { %v379_v30 = vadd.f32 %v378_v28, %v1290_v18 }
 0x131   :  { %v456_v31 = vmax.f32 %v266_v26, 0.0  ;;  %v755_v32 = vadd.f32 %v754_v29, %v642_v27 }
 0x132   :  { %v457_v33 = vmax.f32 %v379_v30, 0.0 }
 0x133   :  { %848 = vst.msk [vmem:[%s1638_s5 + $0x8] sm:$0xff] %vm90_vm1, %v755_v32  ;;  %691 = vmatmul.f32.gmra.mxu2 %v456_v31 }
 0x134   :  { %968 = vmatmul.msk.f32.gmra.mxu3 %vm520_vm3, %v457_v33 }
 0x136   :  { %v268_v34 = vpop.f32.mrf.mxu0  ;;  %v644_v35 = vpop.f32.mrf.mxu2 }
 0x137   :  { %v269_v36 = vadd.f32 %v268_v34, %v1288_v17  ;;  %v645_v37 = vadd.f32 %v1426_v11, %v644_v35  ;;  %v381_v38 = vpop.f32.mrf.mxu1  ;;  %v757_v39 = vpop.f32.mrf.mxu3 }
 0x138   :  { %v382_v40 = vadd.f32 %v381_v38, %v1290_v18 }
 0x139   :  { %v458_v41 = vmax.f32 %v269_v36, 0.0  ;;  %v758_v42 = vadd.f32 %v757_v39, %v645_v37 }
 0x13a   :  { %v459_v43 = vmax.f32 %v382_v40, 0.0 }
 0x13b   :  { %849 = vst.msk [vmem:[%s1638_s5 + $0x10] sm:$0xff] %vm90_vm1, %v758_v42  ;;  %694 = vmatmul.f32.gmra.mxu2 %v458_v41 }
 0x13c   :  { %969 = vmatmul.msk.f32.gmra.mxu3 %vm520_vm3, %v459_v43 }
 0x13e   :  { %v271_v44 = vpop.f32.mrf.mxu0  ;;  %v647_v45 = vpop.f32.mrf.mxu2 }
 0x13f   :  { %v272_v46 = vadd.f32 %v271_v44, %v1288_v17  ;;  %v648_v47 = vadd.f32 %v1426_v11, %v647_v45  ;;  %v384_v48 = vpop.f32.mrf.mxu1  ;;  %v760_v49 = vpop.f32.mrf.mxu3 }
 0x140   :  { %v385_v50 = vadd.f32 %v384_v48, %v1290_v18 }
 0x141   :  { %v460_v51 = vmax.f32 %v272_v46, 0.0  ;;  %v761_v52 = vadd.f32 %v760_v49, %v648_v47 }
 0x142   :  { %v461_v53 = vmax.f32 %v385_v50, 0.0 }
 0x143   :  { %850 = vst.msk [vmem:[%s1638_s5 + $0x18] sm:$0xff] %vm90_vm1, %v761_v52  ;;  %697 = vmatmul.f32.gmra.mxu2 %v460_v51 }
 0x144   :  { %970 = vmatmul.msk.f32.gmra.mxu3 %vm520_vm3, %v461_v53 }
 0x146   :  { %v274_v54 = vpop.f32.mrf.mxu0  ;;  %v650_v55 = vpop.f32.mrf.mxu2 }
 0x147   :  { %v275_v56 = vadd.f32 %v274_v54, %v1288_v17  ;;  %v651_v57 = vadd.f32 %v1426_v11, %v650_v55  ;;  %v387_v58 = vpop.f32.mrf.mxu1  ;;  %v763_v59 = vpop.f32.mrf.mxu3 }
 0x148   :  { %v388_v60 = vadd.f32 %v387_v58, %v1290_v18 }
 0x149   :  { %v462_v61 = vmax.f32 %v275_v56, 0.0  ;;  %v764_v62 = vadd.f32 %v763_v59, %v651_v57 }
 0x14a   :  { %v463_v63 = vmax.f32 %v388_v60, 0.0 }
 0x14b   :  { %851 = vst.msk [vmem:[%s1638_s5 + $0x20] sm:$0xff] %vm90_vm1, %v764_v62  ;;  %700 = vmatmul.f32.gmra.mxu2 %v462_v61 }
 0x14c   :  { %971 = vmatmul.msk.f32.gmra.mxu3 %vm520_vm3, %v463_v63 }
 0x14e   :  { %v277_v0 = vpop.f32.mrf.mxu0  ;;  %v653_v1 = vpop.f32.mrf.mxu2 }
 0x14f   :  { %v278_v2 = vadd.f32 %v277_v0, %v1288_v17  ;;  %v654_v3 = vadd.f32 %v1426_v11, %v653_v1  ;;  %v390_v4 = vpop.f32.mrf.mxu1  ;;  %v766_v5 = vpop.f32.mrf.mxu3 }
 0x150   :  { %v391_v6 = vadd.f32 %v390_v4, %v1290_v18 }
 0x151   :  { %v464_v7 = vmax.f32 %v278_v2, 0.0  ;;  %v767_v8 = vadd.f32 %v766_v5, %v654_v3 }
 0x152   :  { %v465_v9 = vmax.f32 %v391_v6, 0.0 }
 0x153   :  { %852 = vst.msk [vmem:[%s1638_s5 + $0x28] sm:$0xff] %vm90_vm1, %v767_v8  ;;  %703 = vmatmul.f32.gmra.mxu2 %v464_v7 }
 0x154   :  { %972 = vmatmul.msk.f32.gmra.mxu3 %vm520_vm3, %v465_v9 }
 0x156   :  { %v280_v10 = vpop.f32.mrf.mxu0  ;;  %v656_v12 = vpop.f32.mrf.mxu2 }
 0x157   :  { %v281_v13 = vadd.f32 %v280_v10, %v1288_v17  ;;  %v657_v14 = vadd.f32 %v1426_v11, %v656_v12  ;;  %v393_v15 = vpop.f32.mrf.mxu1  ;;  %v769_v16 = vpop.f32.mrf.mxu3 }
 0x158   :  { %v394_v19 = vadd.f32 %v393_v15, %v1290_v18 }
 0x159   :  { %v466_v20 = vmax.f32 %v281_v13, 0.0  ;;  %v770_v21 = vadd.f32 %v769_v16, %v657_v14 }
 0x15a   :  { %v467_v22 = vmax.f32 %v394_v19, 0.0 }
 0x15b   :  { %853 = vst.msk [vmem:[%s1638_s5 + $0x30] sm:$0xff] %vm90_vm1, %v770_v21  ;;  %706 = vmatmul.f32.gmra.mxu2 %v466_v20 }
 0x15c   :  { %973 = vmatmul.msk.f32.gmra.mxu3 %vm520_vm3, %v467_v22 }
 0x15e   :  { %v283_v23 = vpop.f32.mrf.mxu0  ;;  %v659_v24 = vpop.f32.mrf.mxu2 }
 0x15f   :  { %v284_v25 = vadd.f32 %v283_v23, %v1288_v17  ;;  %v660_v26 = vadd.f32 %v1426_v11, %v659_v24  ;;  %v396_v27 = vpop.f32.mrf.mxu1  ;;  %v772_v28 = vpop.f32.mrf.mxu3 }
 0x160   :  { %v397_v29 = vadd.f32 %v396_v27, %v1290_v18 }
 0x161   :  { %v468_v30 = vmax.f32 %v284_v25, 0.0  ;;  %v773_v31 = vadd.f32 %v772_v28, %v660_v26 }
 0x162   :  { %v469_v32 = vmax.f32 %v397_v29, 0.0 }
 0x163   :  { %854 = vst.msk [vmem:[%s1638_s5 + $0x38] sm:$0xff] %vm90_vm1, %v773_v31  ;;  %709 = vmatmul.f32.gmra.mxu2 %v468_v30 }
 0x164   :  { %974 = vmatmul.msk.f32.gmra.mxu3 %vm520_vm3, %v469_v32 }
 0x166   :  { %v286_v33 = vpop.f32.mrf.mxu0  ;;  %v662_v34 = vpop.f32.mrf.mxu2 }
 0x167   :  { %v287_v35 = vadd.f32 %v286_v33, %v1288_v17  ;;  %v663_v36 = vadd.f32 %v1426_v11, %v662_v34  ;;  %v399_v37 = vpop.f32.mrf.mxu1  ;;  %v775_v38 = vpop.f32.mrf.mxu3 }
 0x168   :  { %v400_v39 = vadd.f32 %v399_v37, %v1290_v18 }
 0x169   :  { %v470_v40 = vmax.f32 %v287_v35, 0.0  ;;  %v776_v41 = vadd.f32 %v775_v38, %v663_v36 }
 0x16a   :  { %v471_v42 = vmax.f32 %v400_v39, 0.0 }
 0x16b   :  { %855 = vst.msk [vmem:[%s1638_s5 + $0x40] sm:$0xff] %vm90_vm1, %v776_v41  ;;  %712 = vmatmul.f32.gmra.mxu2 %v470_v40 }
 0x16c   :  { %975 = vmatmul.msk.f32.gmra.mxu3 %vm520_vm3, %v471_v42 }
 0x16e   :  { %v289_v43 = vpop.f32.mrf.mxu0  ;;  %v665_v44 = vpop.f32.mrf.mxu2 }
 0x16f   :  { %v290_v45 = vadd.f32 %v289_v43, %v1288_v17  ;;  %v666_v46 = vadd.f32 %v1426_v11, %v665_v44  ;;  %v402_v47 = vpop.f32.mrf.mxu1  ;;  %v778_v48 = vpop.f32.mrf.mxu3 }
 0x170   :  { %v403_v49 = vadd.f32 %v402_v47, %v1290_v18 }
 0x171   :  { %v472_v50 = vmax.f32 %v290_v45, 0.0  ;;  %v779_v51 = vadd.f32 %v778_v48, %v666_v46 }
 0x172   :  { %v473_v52 = vmax.f32 %v403_v49, 0.0 }
 0x173   :  { %856 = vst.msk [vmem:[%s1638_s5 + $0x48] sm:$0xff] %vm90_vm1, %v779_v51  ;;  %715 = vmatmul.f32.gmra.mxu2 %v472_v50 }
 0x174   :  { %976 = vmatmul.msk.f32.gmra.mxu3 %vm520_vm3, %v473_v52 }
 0x176   :  { %v292_v53 = vpop.f32.mrf.mxu0  ;;  %v668_v54 = vpop.f32.mrf.mxu2 }
 0x177   :  { %v293_v55 = vadd.f32 %v292_v53, %v1288_v17  ;;  %v669_v56 = vadd.f32 %v1426_v11, %v668_v54  ;;  %v405_v57 = vpop.f32.mrf.mxu1  ;;  %v781_v58 = vpop.f32.mrf.mxu3 }
 0x178   :  { %v406_v59 = vadd.f32 %v405_v57, %v1290_v18 }
 0x179   :  { %v474_v60 = vmax.f32 %v293_v55, 0.0  ;;  %v782_v61 = vadd.f32 %v781_v58, %v669_v56 }
 0x17a   :  { %v475_v62 = vmax.f32 %v406_v59, 0.0 }
 0x17b   :  { %857 = vst.msk [vmem:[%s1638_s5 + $0x50] sm:$0xff] %vm90_vm1, %v782_v61  ;;  %718 = vmatmul.f32.gmra.mxu2 %v474_v60 }
 0x17c   :  { %977 = vmatmul.msk.f32.gmra.mxu3 %vm520_vm3, %v475_v62 }
 0x17e   :  { %v295_v63 = vpop.f32.mrf.mxu0  ;;  %v671_v0 = vpop.f32.mrf.mxu2 }
 0x17f   :  { %v296_v1 = vadd.f32 %v295_v63, %v1288_v17  ;;  %v672_v2 = vadd.f32 %v1426_v11, %v671_v0  ;;  %v408_v3 = vpop.f32.mrf.mxu1  ;;  %v784_v4 = vpop.f32.mrf.mxu3 }
 0x180   :  { %v409_v5 = vadd.f32 %v408_v3, %v1290_v18 }
 0x181   :  { %v476_v6 = vmax.f32 %v296_v1, 0.0  ;;  %v785_v7 = vadd.f32 %v784_v4, %v672_v2 }
 0x182   :  { %v477_v8 = vmax.f32 %v409_v5, 0.0 }
 0x183   :  { %858 = vst.msk [vmem:[%s1638_s5 + $0x58] sm:$0xff] %vm90_vm1, %v785_v7  ;;  %721 = vmatmul.f32.gmra.mxu2 %v476_v6 }
 0x184   :  { %978 = vmatmul.msk.f32.gmra.mxu3 %vm520_vm3, %v477_v8 }
 0x186   :  { %v298_v9 = vpop.f32.mrf.mxu0  ;;  %v674_v10 = vpop.f32.mrf.mxu2 }
 0x187   :  { %v299_v12 = vadd.f32 %v298_v9, %v1288_v17  ;;  %v675_v13 = vadd.f32 %v1426_v11, %v674_v10  ;;  %v411_v14 = vpop.f32.mrf.mxu1  ;;  %v787_v15 = vpop.f32.mrf.mxu3 }
 0x188   :  { %v412_v16 = vadd.f32 %v411_v14, %v1290_v18 }
 0x189   :  { %v478_v19 = vmax.f32 %v299_v12, 0.0  ;;  %v788_v20 = vadd.f32 %v787_v15, %v675_v13 }
 0x18a   :  { %v479_v21 = vmax.f32 %v412_v16, 0.0 }
 0x18b   :  { %859 = vst.msk [vmem:[%s1638_s5 + $0x60] sm:$0xff] %vm90_vm1, %v788_v20  ;;  %724 = vmatmul.f32.gmra.mxu2 %v478_v19 }
 0x18c   :  { %979 = vmatmul.msk.f32.gmra.mxu3 %vm520_vm3, %v479_v21 }
 0x18e   :  { %v301_v22 = vpop.f32.mrf.mxu0  ;;  %v677_v23 = vpop.f32.mrf.mxu2 }
 0x18f   :  { %v302_v24 = vadd.f32 %v301_v22, %v1288_v17  ;;  %v678_v25 = vadd.f32 %v1426_v11, %v677_v23  ;;  %v414_v26 = vpop.f32.mrf.mxu1  ;;  %v790_v27 = vpop.f32.mrf.mxu3 }
 0x190   :  { %v415_v28 = vadd.f32 %v414_v26, %v1290_v18 }
 0x191   :  { %v480_v29 = vmax.f32 %v302_v24, 0.0  ;;  %v791_v30 = vadd.f32 %v790_v27, %v678_v25 }
 0x192   :  { %v481_v31 = vmax.f32 %v415_v28, 0.0 }
 0x193   :  { %860 = vst.msk [vmem:[%s1638_s5 + $0x68] sm:$0xff] %vm90_vm1, %v791_v30  ;;  %727 = vmatmul.f32.gmra.mxu2 %v480_v29 }
 0x194   :  { %980 = vmatmul.msk.f32.gmra.mxu3 %vm520_vm3, %v481_v31 }
 0x196   :  { %v304_v32 = vpop.f32.mrf.mxu0  ;;  %v680_v33 = vpop.f32.mrf.mxu2 }
 0x197   :  { %v305_v34 = vadd.f32 %v304_v32, %v1288_v17  ;;  %v681_v35 = vadd.f32 %v1426_v11, %v680_v33  ;;  %v417_v36 = vpop.f32.mrf.mxu1  ;;  %v793_v37 = vpop.f32.mrf.mxu3 }
 0x198   :  { %v418_v38 = vadd.f32 %v417_v36, %v1290_v18 }
 0x199   :  { %v482_v39 = vmax.f32 %v305_v34, 0.0  ;;  %v794_v40 = vadd.f32 %v793_v37, %v681_v35 }
 0x19a   :  { %v483_v41 = vmax.f32 %v418_v38, 0.0 }
 0x19b   :  { %861 = vst.msk [vmem:[%s1638_s5 + $0x70] sm:$0xff] %vm90_vm1, %v794_v40  ;;  %730 = vmatmul.f32.gmra.mxu2 %v482_v39 }
 0x19c   :  { %981 = vmatmul.msk.f32.gmra.mxu3 %vm520_vm3, %v483_v41 }
 0x19e   :  { %v683_v42 = vpop.f32.mrf.mxu2 }
 0x19f   :  { %v684_v17 = vadd.f32 %v1426_v11, %v683_v42  ;;  %v796_v43 = vpop.f32.mrf.mxu3 }
 0x1a1   :  { %v797_v44 = vadd.f32 %v796_v43, %v684_v17 }
 0x1a3   :  { %862 = vst.msk [vmem:[%s1638_s5 + $0x78] sm:$0xff] %vm90_vm1, %v797_v44 }
 0x1a6   :  { %v686_v18 = vpop.f32.mrf.mxu2 }
 0x1a7   :  { %v687_v45 = vadd.f32 %v1426_v11, %v686_v18  ;;  %v799_v46 = vpop.f32.mrf.mxu3 }
 0x1a9   :  { %v800_v47 = vadd.f32 %v799_v46, %v687_v45 }
 0x1ab   :  { %863 = vst.msk [vmem:[%s1638_s5 + $0x80] sm:$0xff] %vm90_vm1, %v800_v47 }
 0x1ae   :  { %v689_v48 = vpop.f32.mrf.mxu2 }
 0x1af   :  { %v690_v49 = vadd.f32 %v1426_v11, %v689_v48  ;;  %v802_v50 = vpop.f32.mrf.mxu3 }
 0x1b1   :  { %v803_v51 = vadd.f32 %v802_v50, %v690_v49 }
 0x1b3   :  { %864 = vst.msk [vmem:[%s1638_s5 + $0x88] sm:$0xff] %vm90_vm1, %v803_v51 }
 0x1b6   :  { %v692_v52 = vpop.f32.mrf.mxu2 }
 0x1b7   :  { %v693_v53 = vadd.f32 %v1426_v11, %v692_v52  ;;  %v805_v54 = vpop.f32.mrf.mxu3 }
 0x1b9   :  { %v806_v55 = vadd.f32 %v805_v54, %v693_v53 }
 0x1bb   :  { %865 = vst.msk [vmem:[%s1638_s5 + $0x90] sm:$0xff] %vm90_vm1, %v806_v55 }
 0x1be   :  { %v695_v56 = vpop.f32.mrf.mxu2 }
 0x1bf   :  { %v696_v57 = vadd.f32 %v1426_v11, %v695_v56  ;;  %v808_v58 = vpop.f32.mrf.mxu3 }
 0x1c1   :  { %v809_v59 = vadd.f32 %v808_v58, %v696_v57 }
 0x1c3   :  { %866 = vst.msk [vmem:[%s1638_s5 + $0x98] sm:$0xff] %vm90_vm1, %v809_v59 }
 0x1c6   :  { %v698_v60 = vpop.f32.mrf.mxu2 }
 0x1c7   :  { %v699_v61 = vadd.f32 %v1426_v11, %v698_v60  ;;  %v811_v62 = vpop.f32.mrf.mxu3 }
 0x1c9   :  { %v812_v63 = vadd.f32 %v811_v62, %v699_v61 }
 0x1cb   :  { %867 = vst.msk [vmem:[%s1638_s5 + $0xa0] sm:$0xff] %vm90_vm1, %v812_v63 }
 0x1ce   :  { %v701_v0 = vpop.f32.mrf.mxu2 }
 0x1cf   :  { %v702_v1 = vadd.f32 %v1426_v11, %v701_v0  ;;  %v814_v2 = vpop.f32.mrf.mxu3 }
 0x1d1   :  { %v815_v3 = vadd.f32 %v814_v2, %v702_v1 }
 0x1d3   :  { %868 = vst.msk [vmem:[%s1638_s5 + $0xa8] sm:$0xff] %vm90_vm1, %v815_v3 }
 0x1d6   :  { %v704_v4 = vpop.f32.mrf.mxu2 }
 0x1d7   :  { %v705_v5 = vadd.f32 %v1426_v11, %v704_v4  ;;  %v817_v6 = vpop.f32.mrf.mxu3 }
 0x1d9   :  { %v818_v7 = vadd.f32 %v817_v6, %v705_v5 }
 0x1db   :  { %869 = vst.msk [vmem:[%s1638_s5 + $0xb0] sm:$0xff] %vm90_vm1, %v818_v7 }
 0x1de   :  { %v707_v8 = vpop.f32.mrf.mxu2 }
 0x1df   :  { %v708_v9 = vadd.f32 %v1426_v11, %v707_v8  ;;  %v820_v10 = vpop.f32.mrf.mxu3 }
 0x1e1   :  { %v821_v12 = vadd.f32 %v820_v10, %v708_v9 }
 0x1e3   :  { %870 = vst.msk [vmem:[%s1638_s5 + $0xb8] sm:$0xff] %vm90_vm1, %v821_v12 }
 0x1e6   :  { %v710_v13 = vpop.f32.mrf.mxu2 }
 0x1e7   :  { %v711_v14 = vadd.f32 %v1426_v11, %v710_v13  ;;  %v823_v15 = vpop.f32.mrf.mxu3 }
 0x1e9   :  { %v824_v16 = vadd.f32 %v823_v15, %v711_v14 }
 0x1eb   :  { %871 = vst.msk [vmem:[%s1638_s5 + $0xc0] sm:$0xff] %vm90_vm1, %v824_v16 }
 0x1ee   :  { %v713_v19 = vpop.f32.mrf.mxu2 }
 0x1ef   :  { %v714_v20 = vadd.f32 %v1426_v11, %v713_v19  ;;  %v826_v21 = vpop.f32.mrf.mxu3 }
 0x1f1   :  { %v827_v22 = vadd.f32 %v826_v21, %v714_v20 }
 0x1f3   :  { %872 = vst.msk [vmem:[%s1638_s5 + $0xc8] sm:$0xff] %vm90_vm1, %v827_v22 }
 0x1f6   :  { %v716_v23 = vpop.f32.mrf.mxu2 }
 0x1f7   :  { %v717_v24 = vadd.f32 %v1426_v11, %v716_v23  ;;  %v829_v25 = vpop.f32.mrf.mxu3 }
 0x1f9   :  { %v830_v26 = vadd.f32 %v829_v25, %v717_v24 }
 0x1fb   :  { %873 = vst.msk [vmem:[%s1638_s5 + $0xd0] sm:$0xff] %vm90_vm1, %v830_v26 }
 0x1fe   :  { %v719_v27 = vpop.f32.mrf.mxu2 }
 0x1ff   :  { %v720_v28 = vadd.f32 %v1426_v11, %v719_v27  ;;  %v832_v29 = vpop.f32.mrf.mxu3 }
 0x201   :  { %v833_v30 = vadd.f32 %v832_v29, %v720_v28 }
 0x203   :  { %874 = vst.msk [vmem:[%s1638_s5 + $0xd8] sm:$0xff] %vm90_vm1, %v833_v30 }
 0x206   :  { %v722_v31 = vpop.f32.mrf.mxu2 }
 0x207   :  { %v723_v32 = vadd.f32 %v1426_v11, %v722_v31  ;;  %v835_v33 = vpop.f32.mrf.mxu3 }
 0x209   :  { %v836_v34 = vadd.f32 %v835_v33, %v723_v32 }
 0x20b   :  { %875 = vst.msk [vmem:[%s1638_s5 + $0xe0] sm:$0xff] %vm90_vm1, %v836_v34 }
 0x20e   :  { %v725_v35 = vpop.f32.mrf.mxu2 }
 0x20f   :  { %v726_v36 = vadd.f32 %v1426_v11, %v725_v35  ;;  %v838_v37 = vpop.f32.mrf.mxu3 }
 0x211   :  { %v839_v38 = vadd.f32 %v838_v37, %v726_v36 }
 0x213   :  { %876 = vst.msk [vmem:[%s1638_s5 + $0xe8] sm:$0xff] %vm90_vm1, %v839_v38 }
 0x216   :  { %v728_v39 = vpop.f32.mrf.mxu2 }
 0x217   :  { %v729_v40 = vadd.f32 %v1426_v11, %v728_v39  ;;  %v841_v41 = vpop.f32.mrf.mxu3 }
 0x219   :  { %v842_v42 = vadd.f32 %v841_v41, %v729_v40 }
 0x21b   :  { %877 = vst.msk [vmem:[%s1638_s5 + $0xf0] sm:$0xff] %vm90_vm1, %v842_v42 }
 0x21e   :  { %v731_v17 = vpop.f32.mrf.mxu2 }
 0x21f   :  { %v732_v43 = vadd.f32 %v1426_v11, %v731_v17  ;;  %v844_v44 = vpop.f32.mrf.mxu3 }
 0x221   :  { %v845_v18 = vadd.f32 %v844_v44, %v732_v43 }
 0x223   :  { %878 = vst.msk [vmem:[%s1638_s5 + $0xf8] sm:$0xff] %vm90_vm1, %v845_v18 }

</bundles_post_ra>
